<compile_context>
chip_gen: v7x
topology: tpu7x:2x2x1
jax: 0.10.0
libtpu: 0.0.40
codegen_flags: <defaults>
</compile_context>

<pallas_src>
import jax
import jax.numpy as jnp
from jax.experimental import pallas as pl
from jax.experimental.pallas import tpu as pltpu

DTYPE = jnp.bfloat16
BN_EPS = 1e-5


# --------------------------------------------------------------------------
# Parameter preparation (host/XLA side, done once)
# --------------------------------------------------------------------------
def fold_bn(gamma, beta, rmean, rvar, eps=BN_EPS):
    scale = gamma / jnp.sqrt(rvar + eps)
    shift = beta - rmean * scale
    return scale, shift


def pack_down_weights(w_hwio, scale):
    """Stride-2 3x3 conv -> 4 taps over a space-to-depth(2) input.

    Returns (4, 4*Cin, Cout); tap t = 2*by + bx; K ordered as (py, px, ci).
    """
    cin, cout = w_hwio.shape[2], w_hwio.shape[3]
    wf = w_hwio * scale[None, None, None, :]           # fold BN scale
    w4 = jnp.zeros((2, 2, 2, 2, cin, cout), wf.dtype)   # (by, bx, py, px, ci, co)
    for by in range(2):
        for bx in range(2):
            for py in range(2):
                for px in range(2):
                    dy, dx = 2 * by + py, 2 * bx + px
                    if dy < 3 and dx < 3:
                        w4 = w4.at[by, bx, py, px].set(wf[dy, dx])
    return w4.reshape(4, 4 * cin, cout)


def pack_conv_weights(w_hwio, scale):
    """Stride-1 3x3 conv -> (9, Cin, Cout), tap t = 3*dy + dx, scale folded."""
    wf = w_hwio * scale[None, None, None, :]
    cin, cout = wf.shape[2], wf.shape[3]
    return wf.reshape(9, cin, cout)


def prepare_params(raw_params):
    """raw_params: 3x (w_hwio, gamma, beta, running_mean, running_var)."""
    (w0, g0, b0, m0, v0), (w1, g1, b1, m1, v1), (w2, g2, b2, m2, v2) = raw_params
    s0, sh0 = fold_bn(g0, b0, m0, v0)
    s1, sh1 = fold_bn(g1, b1, m1, v1)
    s2, sh2 = fold_bn(g2, b2, m2, v2)
    return (
        pack_down_weights(w0, s0).astype(DTYPE), sh0.reshape(1, -1).astype(jnp.float32),
        pack_conv_weights(w1, s1).astype(DTYPE), sh1.reshape(1, -1).astype(jnp.float32),
        pack_conv_weights(w2, s2).astype(DTYPE), sh2.reshape(1, -1).astype(jnp.float32),
    )


# --------------------------------------------------------------------------
# Fused kernel: downscale conv + 2x (conv -> BN -> ReLU), all in VMEM
# --------------------------------------------------------------------------
def _down_block_kernel(xs2d_ref, w0_ref, b0_ref, w1_ref, b1_ref, w2_ref, b2_ref,
                       o_ref, a1_ref, a2_ref):
    """
    xs2d_ref: (1, Ho+1, Wo+1, 4*Cin)  space-to-depth(2) of the padded input (bf16)
    w0_ref:   (4, 4*Cin, Cout)        packed stride-2 conv weights (scale folded, bf16)
    b0_ref:   (1, Cout)               BN shift (f32)
    w1_ref:   (9, Cout, Cout)         3x3 taps, scale folded (bf16)   [CvBlock conv 1]
    b1_ref:   (1, Cout)
    w2_ref:   (9, Cout, Cout)                                          [CvBlock conv 2]
    b2_ref:   (1, Cout)
    o_ref:    (1, Ho*Wo, Cout)        f32 output (flat spatial)
    a1_ref:   (Ho+2, Wo+2, Cout)      bf16 VMEM scratch (padded stage-1 activation)
    a2_ref:   (Ho+2, Wo+2, Cout)      bf16 VMEM scratch (padded stage-2 activation)
    """
    Ho = a1_ref.shape[0] - 2
    Wo = a1_ref.shape[1] - 2
    Cout = o_ref.shape[2]
    M = Ho * Wo

    # Zero halos (interior is fully overwritten below; zero every step so the
    # result does not depend on how grid steps are split across TensorCores).
    a1_ref[...] = jnp.zeros_like(a1_ref)
    a2_ref[...] = jnp.zeros_like(a2_ref)

    x = xs2d_ref[0]                                   # (Ho+1, Wo+1, 4*Cin)

    # ---- stage 1: stride-2 3x3 conv as 2x2 taps over the s2d input ----
    acc = jnp.zeros((M, Cout), jnp.float32)
    for by in range(2):
        for bx in range(2):
            xt = x[by:by + Ho, bx:bx + Wo, :].reshape(M, -1)
            acc = acc + jnp.dot(xt, w0_ref[2 * by + bx],
                                preferred_element_type=jnp.float32)
    y = jnp.maximum(acc + b0_ref[...], 0.0)           # BN shift + ReLU (f32)
    a1_ref[1:Ho + 1, 1:Wo + 1, :] = y.reshape(Ho, Wo, Cout).astype(a1_ref.dtype)

    # ---- stage 2: 3x3 conv, stride 1, zero-padded in scratch ----
    acc = jnp.zeros((M, Cout), jnp.float32)
    for dy in range(3):
        for dx in range(3):
            xt = a1_ref[dy:dy + Ho, dx:dx + Wo, :].reshape(M, Cout)
            acc = acc + jnp.dot(xt, w1_ref[3 * dy + dx],
                                preferred_element_type=jnp.float32)
    y = jnp.maximum(acc + b1_ref[...], 0.0)
    a2_ref[1:Ho + 1, 1:Wo + 1, :] = y.reshape(Ho, Wo, Cout).astype(a2_ref.dtype)

    # ---- stage 3: 3x3 conv, stride 1 ----
    acc = jnp.zeros((M, Cout), jnp.float32)
    for dy in range(3):
        for dx in range(3):
            xt = a2_ref[dy:dy + Ho, dx:dx + Wo, :].reshape(M, Cout)
            acc = acc + jnp.dot(xt, w2_ref[3 * dy + dx],
                                preferred_element_type=jnp.float32)
    y = jnp.maximum(acc + b2_ref[...], 0.0)
    o_ref[0] = y.astype(o_ref.dtype)


# --------------------------------------------------------------------------
# Wrapper
# --------------------------------------------------------------------------
@jax.jit
def down_block(x_nchw, w0, b0, w1, b1, w2, b2):
    N, Cin, H, W = x_nchw.shape
    assert H % 2 == 0 and W % 2 == 0, "even spatial dims expected"
    Ho, Wo = H // 2, W // 2
    Cout = w1.shape[-1]

    # NCHW -> NHWC, bf16, pad=1, space-to-depth(2). All cheap XLA rearranges of
    # the (small) input; everything downstream stays in VMEM.
    x = jnp.transpose(x_nchw, (0, 2, 3, 1)).astype(DTYPE)
    xp = jnp.pad(x, ((0, 0), (1, 1), (1, 1), (0, 0)))
    Hs, Ws = Ho + 1, Wo + 1
    xs2d = (xp.reshape(N, Hs, 2, Ws, 2, Cin)
              .transpose(0, 1, 3, 2, 4, 5)
              .reshape(N, Hs, Ws, 4 * Cin))

    out_flat = pl.pallas_call(
        _down_block_kernel,
        out_shape=jax.ShapeDtypeStruct((N, Ho * Wo, Cout), jnp.float32),
        grid_spec=pltpu.PrefetchScalarGridSpec(
            num_scalar_prefetch=0,
            grid=(N,),
            in_specs=[
                pl.BlockSpec((1, Hs, Ws, 4 * Cin), lambda n: (n, 0, 0, 0)),
                pl.BlockSpec((4, 4 * Cin, Cout), lambda n: (0, 0, 0)),
                pl.BlockSpec((1, Cout), lambda n: (0, 0)),
                pl.BlockSpec((9, Cout, Cout), lambda n: (0, 0, 0)),
                pl.BlockSpec((1, Cout), lambda n: (0, 0)),
                pl.BlockSpec((9, Cout, Cout), lambda n: (0, 0, 0)),
                pl.BlockSpec((1, Cout), lambda n: (0, 0)),
            ],
            out_specs=pl.BlockSpec((1, Ho * Wo, Cout), lambda n: (n, 0, 0)),
            scratch_shapes=[
                pltpu.VMEM((Ho + 2, Wo + 2, Cout), DTYPE),
                pltpu.VMEM((Ho + 2, Wo + 2, Cout), DTYPE),
            ],
        ),
        compiler_params=pltpu.CompilerParams(
            dimension_semantics=("parallel",),
            # Far above what these tiles need; raise + row-tile for real frames.
            vmem_limit_bytes=32 * 1024 * 1024,
        ),
    )(xs2d, w0, b0, w1, b1, w2, b2)

    out = out_flat.reshape(N, Ho, Wo, Cout)
    return jnp.transpose(out, (0, 3, 1, 2))            # NHWC -> NCHW, f32


# --------------------------------------------------------------------------
# Deterministic synthetic parameters + precision-matched reference
# --------------------------------------------------------------------------
def make_raw_params(key, in_ch, out_ch):
    chans = [(in_ch, out_ch), (out_ch, out_ch), (out_ch, out_ch)]
    params = []
    for ci, co in chans:
        key, kw, kg, kb, km, kv = jax.random.split(key, 6)
        w_oihw = jax.random.normal(kw, (co, ci, 3, 3), jnp.float32) * 0.2
        w_hwio = jnp.transpose(w_oihw, (2, 3, 1, 0))
        gamma = 0.5 + jax.random.uniform(kg, (co,), jnp.float32)
        beta = 0.1 * jax.random.normal(kb, (co,), jnp.float32)
        rmean = 0.1 * jax.random.normal(km, (co,), jnp.float32)
        rvar = 0.5 + jax.random.uniform(kv, (co,), jnp.float32)
        params.append((w_hwio, gamma, beta, rmean, rvar))
    return params


def ref_down_block(x_nchw, raw_params):
    """lax.conv reference with the same BN folding / bf16 cast points."""
    x = jnp.transpose(x_nchw, (0, 2, 3, 1)).astype(DTYPE)
    strides = (2, 1, 1)
    for i, (w, gamma, beta, rmean, rvar) in enumerate(raw_params):
        scale, shift = fold_bn(gamma, beta, rmean, rvar)
        wf = (w * scale[None, None, None, :]).astype(DTYPE)
        y = jax.lax.conv_general_dilated(
            x, wf, (strides[i], strides[i]), ((1, 1), (1, 1)),
            dimension_numbers=("NHWC", "HWIO", "NHWC"),
            preferred_element_type=jnp.float32)
        y = jnp.maximum(y + shift.reshape(1, 1, 1, -1), 0.0)
        x = y.astype(DTYPE) if i < 2 else y
    return jnp.transpose(x, (0, 3, 1, 2)).astype(jnp.float32)


if __name__ == "__main__":
    key = jax.random.PRNGKey(0)
    N, IN_CH, OUT_CH, H, W = 2, 4, 8, 16, 16

    key, kx = jax.random.split(key)
    x = jax.random.normal(kx, (N, IN_CH, H, W), jnp.float32)   # NCHW like PyTorch

    raw_params = make_raw_params(key, IN_CH, OUT_CH)
    packed = prepare_params(raw_params)

    out = jax.block_until_ready(down_block(x, *packed))
    assert out.shape == (N, OUT_CH, H // 2, W // 2), out.shape

    ref = jax.block_until_ready(ref_down_block(x, raw_params))
    max_err = float(jnp.max(jnp.abs(out - ref)))
    assert jnp.allclose(out, ref, rtol=2e-2, atol=2e-2), max_err

    print("KERNEL_OK")
</pallas_src>

<mosaic_0001>
module attributes {stable_mosaic.version = 11 : i64} {
  func.func @_down_block_kernel(%arg0: i32, %arg1: memref<1x9x9x16xbf16, #tpu.memory_space<vmem>>, %arg2: memref<4x16x8xbf16, #tpu.memory_space<vmem>>, %arg3: memref<1x8xf32, #tpu.memory_space<vmem>>, %arg4: memref<9x8x8xbf16, #tpu.memory_space<vmem>>, %arg5: memref<1x8xf32, #tpu.memory_space<vmem>>, %arg6: memref<9x8x8xbf16, #tpu.memory_space<vmem>>, %arg7: memref<1x8xf32, #tpu.memory_space<vmem>>, %arg8: memref<1x64x8xf32, #tpu.memory_space<vmem>>, %arg9: memref<10x10x8xbf16, #tpu.memory_space<vmem>>, %arg10: memref<10x10x8xbf16, #tpu.memory_space<vmem>>) attributes {dimension_semantics = [#tpu.dimension_semantics<parallel>], iteration_bounds = array<i64: 2>, scalar_prefetch = 0 : i64, scratch_operands = 2 : i64, tpu.core_type = #tpu.core_type<tc>, window_params = [{transform_indices = @transform_0, window_bounds = array<i64: 1, 9, 9, 16>}, {pipeline_mode = #tpu.pipeline_mode<synchronous>, transform_indices = @transform_1, window_bounds = array<i64: 4, 16, 8>}, {pipeline_mode = #tpu.pipeline_mode<synchronous>, transform_indices = @transform_2, window_bounds = array<i64: 1, 8>}, {pipeline_mode = #tpu.pipeline_mode<synchronous>, transform_indices = @transform_3, window_bounds = array<i64: 9, 8, 8>}, {pipeline_mode = #tpu.pipeline_mode<synchronous>, transform_indices = @transform_4, window_bounds = array<i64: 1, 8>}, {pipeline_mode = #tpu.pipeline_mode<synchronous>, transform_indices = @transform_5, window_bounds = array<i64: 9, 8, 8>}, {pipeline_mode = #tpu.pipeline_mode<synchronous>, transform_indices = @transform_6, window_bounds = array<i64: 1, 8>}, {transform_indices = @transform_7, window_bounds = array<i64: 1, 64, 8>}]} {
    %cst = arith.constant 0.000000e+00 : bf16
    %0 = vector.broadcast %cst : bf16 to vector<10x10x8xbf16>
    %c0 = arith.constant 0 : index
    %c0_0 = arith.constant 0 : index
    %c0_1 = arith.constant 0 : index
    %1 = vector.load %arg9[%c0, %c0_0, %c0_1] : memref<10x10x8xbf16, #tpu.memory_space<vmem>>, vector<10x10x8xbf16>
    tpu.vector_store %arg9[%c0, %c0_0, %c0_1], %0 {strides = array<i32>} : memref<10x10x8xbf16, #tpu.memory_space<vmem>>, vector<10x10x8xbf16>,
    %cst_2 = arith.constant 0.000000e+00 : bf16
    %2 = vector.broadcast %cst_2 : bf16 to vector<10x10x8xbf16>
    %c0_3 = arith.constant 0 : index
    %c0_4 = arith.constant 0 : index
    %c0_5 = arith.constant 0 : index
    %3 = vector.load %arg10[%c0_3, %c0_4, %c0_5] : memref<10x10x8xbf16, #tpu.memory_space<vmem>>, vector<10x10x8xbf16>
    tpu.vector_store %arg10[%c0_3, %c0_4, %c0_5], %2 {strides = array<i32>} : memref<10x10x8xbf16, #tpu.memory_space<vmem>>, vector<10x10x8xbf16>,
    %c0_6 = arith.constant 0 : index
    %c0_7 = arith.constant 0 : index
    %c0_8 = arith.constant 0 : index
    %c0_9 = arith.constant 0 : index
    %4 = vector.load %arg1[%c0_6, %c0_7, %c0_8, %c0_9] : memref<1x9x9x16xbf16, #tpu.memory_space<vmem>>, vector<1x9x9x16xbf16>
    %5 = vector.shape_cast %4 : vector<1x9x9x16xbf16> to vector<9x9x16xbf16>
    %cst_10 = arith.constant 0.000000e+00 : f32
    %6 = vector.broadcast %cst_10 : f32 to vector<64x8xf32>
    %7 = vector.extract_strided_slice %5 {offsets = [0, 0, 0], sizes = [8, 8, 16], strides = [1, 1, 1]} : vector<9x9x16xbf16> to vector<8x8x16xbf16>
    %8 = vector.shape_cast %7 : vector<8x8x16xbf16> to vector<64x16xbf16>
    %c0_11 = arith.constant 0 : index
    %c0_12 = arith.constant 0 : index
    %c0_13 = arith.constant 0 : index
    %9 = vector.load %arg2[%c0_11, %c0_12, %c0_13] : memref<4x16x8xbf16, #tpu.memory_space<vmem>>, vector<1x16x8xbf16>
    %10 = vector.shape_cast %9 : vector<1x16x8xbf16> to vector<16x8xbf16>
    %cst_14 = arith.constant dense<0.000000e+00> : vector<64x8xf32>
    %11 = tpu.matmul %8, %10, %cst_14 {dimension_numbers = #tpu.dot_dimension_numbers<[1], [0], [0], [1], [0, 0, 1, 1], [], []>} : vector<64x16xbf16>, vector<16x8xbf16>, vector<64x8xf32> -> vector<64x8xf32>
    %12 = arith.addf %6, %11 : vector<64x8xf32>
    %13 = vector.extract_strided_slice %5 {offsets = [0, 1, 0], sizes = [8, 8, 16], strides = [1, 1, 1]} : vector<9x9x16xbf16> to vector<8x8x16xbf16>
    %14 = vector.shape_cast %13 : vector<8x8x16xbf16> to vector<64x16xbf16>
    %c1 = arith.constant 1 : index
    %c0_15 = arith.constant 0 : index
    %c0_16 = arith.constant 0 : index
    %15 = vector.load %arg2[%c1, %c0_15, %c0_16] : memref<4x16x8xbf16, #tpu.memory_space<vmem>>, vector<1x16x8xbf16>
    %16 = vector.shape_cast %15 : vector<1x16x8xbf16> to vector<16x8xbf16>
    %cst_17 = arith.constant dense<0.000000e+00> : vector<64x8xf32>
    %17 = tpu.matmul %14, %16, %cst_17 {dimension_numbers = #tpu.dot_dimension_numbers<[1], [0], [0], [1], [0, 0, 1, 1], [], []>} : vector<64x16xbf16>, vector<16x8xbf16>, vector<64x8xf32> -> vector<64x8xf32>
    %18 = arith.addf %12, %17 : vector<64x8xf32>
    %19 = vector.extract_strided_slice %5 {offsets = [1, 0, 0], sizes = [8, 8, 16], strides = [1, 1, 1]} : vector<9x9x16xbf16> to vector<8x8x16xbf16>
    %20 = vector.shape_cast %19 : vector<8x8x16xbf16> to vector<64x16xbf16>
    %c2 = arith.constant 2 : index
    %c0_18 = arith.constant 0 : index
    %c0_19 = arith.constant 0 : index
    %21 = vector.load %arg2[%c2, %c0_18, %c0_19] : memref<4x16x8xbf16, #tpu.memory_space<vmem>>, vector<1x16x8xbf16>
    %22 = vector.shape_cast %21 : vector<1x16x8xbf16> to vector<16x8xbf16>
    %cst_20 = arith.constant dense<0.000000e+00> : vector<64x8xf32>
    %23 = tpu.matmul %20, %22, %cst_20 {dimension_numbers = #tpu.dot_dimension_numbers<[1], [0], [0], [1], [0, 0, 1, 1], [], []>} : vector<64x16xbf16>, vector<16x8xbf16>, vector<64x8xf32> -> vector<64x8xf32>
    %24 = arith.addf %18, %23 : vector<64x8xf32>
    %25 = vector.extract_strided_slice %5 {offsets = [1, 1, 0], sizes = [8, 8, 16], strides = [1, 1, 1]} : vector<9x9x16xbf16> to vector<8x8x16xbf16>
    %26 = vector.shape_cast %25 : vector<8x8x16xbf16> to vector<64x16xbf16>
    %c3 = arith.constant 3 : index
    %c0_21 = arith.constant 0 : index
    %c0_22 = arith.constant 0 : index
    %27 = vector.load %arg2[%c3, %c0_21, %c0_22] : memref<4x16x8xbf16, #tpu.memory_space<vmem>>, vector<1x16x8xbf16>
    %28 = vector.shape_cast %27 : vector<1x16x8xbf16> to vector<16x8xbf16>
    %cst_23 = arith.constant dense<0.000000e+00> : vector<64x8xf32>
    %29 = tpu.matmul %26, %28, %cst_23 {dimension_numbers = #tpu.dot_dimension_numbers<[1], [0], [0], [1], [0, 0, 1, 1], [], []>} : vector<64x16xbf16>, vector<16x8xbf16>, vector<64x8xf32> -> vector<64x8xf32>
    %30 = arith.addf %24, %29 : vector<64x8xf32>
    %c0_24 = arith.constant 0 : index
    %c0_25 = arith.constant 0 : index
    %31 = vector.load %arg3[%c0_24, %c0_25] : memref<1x8xf32, #tpu.memory_space<vmem>>, vector<1x8xf32>
    %32 = vector.broadcast %31 : vector<1x8xf32> to vector<64x8xf32>
    %33 = arith.addf %30, %32 : vector<64x8xf32>
    %cst_26 = arith.constant 0.000000e+00 : f32
    %34 = vector.broadcast %cst_26 : f32 to vector<64x8xf32>
    %35 = arith.maximumf %33, %34 : vector<64x8xf32>
    %36 = vector.shape_cast %35 : vector<64x8xf32> to vector<8x8x8xf32>
    %37 = arith.truncf %36 : vector<8x8x8xf32> to vector<8x8x8xbf16>
    %c1_27 = arith.constant 1 : index
    %c1_28 = arith.constant 1 : index
    %c0_29 = arith.constant 0 : index
    %38 = vector.load %arg9[%c1_27, %c1_28, %c0_29] : memref<10x10x8xbf16, #tpu.memory_space<vmem>>, vector<8x8x8xbf16>
    tpu.vector_store %arg9[%c1_27, %c1_28, %c0_29], %37 {strides = array<i32>} : memref<10x10x8xbf16, #tpu.memory_space<vmem>>, vector<8x8x8xbf16>,
    %cst_30 = arith.constant 0.000000e+00 : f32
    %39 = vector.broadcast %cst_30 : f32 to vector<64x8xf32>
    %c0_31 = arith.constant 0 : index
    %c0_32 = arith.constant 0 : index
    %c0_33 = arith.constant 0 : index
    %40 = vector.load %arg9[%c0_31, %c0_32, %c0_33] : memref<10x10x8xbf16, #tpu.memory_space<vmem>>, vector<8x8x8xbf16>
    %41 = vector.shape_cast %40 : vector<8x8x8xbf16> to vector<64x8xbf16>
    %c0_34 = arith.constant 0 : index
    %c0_35 = arith.constant 0 : index
    %c0_36 = arith.constant 0 : index
    %42 = vector.load %arg4[%c0_34, %c0_35, %c0_36] : memref<9x8x8xbf16, #tpu.memory_space<vmem>>, vector<1x8x8xbf16>
    %43 = vector.shape_cast %42 : vector<1x8x8xbf16> to vector<8x8xbf16>
    %cst_37 = arith.constant dense<0.000000e+00> : vector<64x8xf32>
    %44 = tpu.matmul %41, %43, %cst_37 {dimension_numbers = #tpu.dot_dimension_numbers<[1], [0], [0], [1], [0, 0, 1, 1], [], []>} : vector<64x8xbf16>, vector<8x8xbf16>, vector<64x8xf32> -> vector<64x8xf32>
    %45 = arith.addf %39, %44 : vector<64x8xf32>
    %c0_38 = arith.constant 0 : index
    %c1_39 = arith.constant 1 : index
    %c0_40 = arith.constant 0 : index
    %46 = vector.load %arg9[%c0_38, %c1_39, %c0_40] : memref<10x10x8xbf16, #tpu.memory_space<vmem>>, vector<8x8x8xbf16>
    %47 = vector.shape_cast %46 : vector<8x8x8xbf16> to vector<64x8xbf16>
    %c1_41 = arith.constant 1 : index
    %c0_42 = arith.constant 0 : index
    %c0_43 = arith.constant 0 : index
    %48 = vector.load %arg4[%c1_41, %c0_42, %c0_43] : memref<9x8x8xbf16, #tpu.memory_space<vmem>>, vector<1x8x8xbf16>
    %49 = vector.shape_cast %48 : vector<1x8x8xbf16> to vector<8x8xbf16>
    %cst_44 = arith.constant dense<0.000000e+00> : vector<64x8xf32>
    %50 = tpu.matmul %47, %49, %cst_44 {dimension_numbers = #tpu.dot_dimension_numbers<[1], [0], [0], [1], [0, 0, 1, 1], [], []>} : vector<64x8xbf16>, vector<8x8xbf16>, vector<64x8xf32> -> vector<64x8xf32>
    %51 = arith.addf %45, %50 : vector<64x8xf32>
    %c0_45 = arith.constant 0 : index
    %c2_46 = arith.constant 2 : index
    %c0_47 = arith.constant 0 : index
    %52 = vector.load %arg9[%c0_45, %c2_46, %c0_47] : memref<10x10x8xbf16, #tpu.memory_space<vmem>>, vector<8x8x8xbf16>
    %53 = vector.shape_cast %52 : vector<8x8x8xbf16> to vector<64x8xbf16>
    %c2_48 = arith.constant 2 : index
    %c0_49 = arith.constant 0 : index
    %c0_50 = arith.constant 0 : index
    %54 = vector.load %arg4[%c2_48, %c0_49, %c0_50] : memref<9x8x8xbf16, #tpu.memory_space<vmem>>, vector<1x8x8xbf16>
    %55 = vector.shape_cast %54 : vector<1x8x8xbf16> to vector<8x8xbf16>
    %cst_51 = arith.constant dense<0.000000e+00> : vector<64x8xf32>
    %56 = tpu.matmul %53, %55, %cst_51 {dimension_numbers = #tpu.dot_dimension_numbers<[1], [0], [0], [1], [0, 0, 1, 1], [], []>} : vector<64x8xbf16>, vector<8x8xbf16>, vector<64x8xf32> -> vector<64x8xf32>
    %57 = arith.addf %51, %56 : vector<64x8xf32>
    %c1_52 = arith.constant 1 : index
    %c0_53 = arith.constant 0 : index
    %c0_54 = arith.constant 0 : index
    %58 = vector.load %arg9[%c1_52, %c0_53, %c0_54] : memref<10x10x8xbf16, #tpu.memory_space<vmem>>, vector<8x8x8xbf16>
    %59 = vector.shape_cast %58 : vector<8x8x8xbf16> to vector<64x8xbf16>
    %c3_55 = arith.constant 3 : index
    %c0_56 = arith.constant 0 : index
    %c0_57 = arith.constant 0 : index
    %60 = vector.load %arg4[%c3_55, %c0_56, %c0_57] : memref<9x8x8xbf16, #tpu.memory_space<vmem>>, vector<1x8x8xbf16>
    %61 = vector.shape_cast %60 : vector<1x8x8xbf16> to vector<8x8xbf16>
    %cst_58 = arith.constant dense<0.000000e+00> : vector<64x8xf32>
    %62 = tpu.matmul %59, %61, %cst_58 {dimension_numbers = #tpu.dot_dimension_numbers<[1], [0], [0], [1], [0, 0, 1, 1], [], []>} : vector<64x8xbf16>, vector<8x8xbf16>, vector<64x8xf32> -> vector<64x8xf32>
    %63 = arith.addf %57, %62 : vector<64x8xf32>
    %c1_59 = arith.constant 1 : index
    %c1_60 = arith.constant 1 : index
    %c0_61 = arith.constant 0 : index
    %64 = vector.load %arg9[%c1_59, %c1_60, %c0_61] : memref<10x10x8xbf16, #tpu.memory_space<vmem>>, vector<8x8x8xbf16>
    %65 = vector.shape_cast %64 : vector<8x8x8xbf16> to vector<64x8xbf16>
    %c4 = arith.constant 4 : index
    %c0_62 = arith.constant 0 : index
    %c0_63 = arith.constant 0 : index
    %66 = vector.load %arg4[%c4, %c0_62, %c0_63] : memref<9x8x8xbf16, #tpu.memory_space<vmem>>, vector<1x8x8xbf16>
    %67 = vector.shape_cast %66 : vector<1x8x8xbf16> to vector<8x8xbf16>
    %cst_64 = arith.constant dense<0.000000e+00> : vector<64x8xf32>
    %68 = tpu.matmul %65, %67, %cst_64 {dimension_numbers = #tpu.dot_dimension_numbers<[1], [0], [0], [1], [0, 0, 1, 1], [], []>} : vector<64x8xbf16>, vector<8x8xbf16>, vector<64x8xf32> -> vector<64x8xf32>
    %69 = arith.addf %63, %68 : vector<64x8xf32>
    %c1_65 = arith.constant 1 : index
    %c2_66 = arith.constant 2 : index
    %c0_67 = arith.constant 0 : index
    %70 = vector.load %arg9[%c1_65, %c2_66, %c0_67] : memref<10x10x8xbf16, #tpu.memory_space<vmem>>, vector<8x8x8xbf16>
    %71 = vector.shape_cast %70 : vector<8x8x8xbf16> to vector<64x8xbf16>
    %c5 = arith.constant 5 : index
    %c0_68 = arith.constant 0 : index
    %c0_69 = arith.constant 0 : index
    %72 = vector.load %arg4[%c5, %c0_68, %c0_69] : memref<9x8x8xbf16, #tpu.memory_space<vmem>>, vector<1x8x8xbf16>
    %73 = vector.shape_cast %72 : vector<1x8x8xbf16> to vector<8x8xbf16>
    %cst_70 = arith.constant dense<0.000000e+00> : vector<64x8xf32>
    %74 = tpu.matmul %71, %73, %cst_70 {dimension_numbers = #tpu.dot_dimension_numbers<[1], [0], [0], [1], [0, 0, 1, 1], [], []>} : vector<64x8xbf16>, vector<8x8xbf16>, vector<64x8xf32> -> vector<64x8xf32>
    %75 = arith.addf %69, %74 : vector<64x8xf32>
    %c2_71 = arith.constant 2 : index
    %c0_72 = arith.constant 0 : index
    %c0_73 = arith.constant 0 : index
    %76 = vector.load %arg9[%c2_71, %c0_72, %c0_73] : memref<10x10x8xbf16, #tpu.memory_space<vmem>>, vector<8x8x8xbf16>
    %77 = vector.shape_cast %76 : vector<8x8x8xbf16> to vector<64x8xbf16>
    %c6 = arith.constant 6 : index
    %c0_74 = arith.constant 0 : index
    %c0_75 = arith.constant 0 : index
    %78 = vector.load %arg4[%c6, %c0_74, %c0_75] : memref<9x8x8xbf16, #tpu.memory_space<vmem>>, vector<1x8x8xbf16>
    %79 = vector.shape_cast %78 : vector<1x8x8xbf16> to vector<8x8xbf16>
    %cst_76 = arith.constant dense<0.000000e+00> : vector<64x8xf32>
    %80 = tpu.matmul %77, %79, %cst_76 {dimension_numbers = #tpu.dot_dimension_numbers<[1], [0], [0], [1], [0, 0, 1, 1], [], []>} : vector<64x8xbf16>, vector<8x8xbf16>, vector<64x8xf32> -> vector<64x8xf32>
    %81 = arith.addf %75, %80 : vector<64x8xf32>
    %c2_77 = arith.constant 2 : index
    %c1_78 = arith.constant 1 : index
    %c0_79 = arith.constant 0 : index
    %82 = vector.load %arg9[%c2_77, %c1_78, %c0_79] : memref<10x10x8xbf16, #tpu.memory_space<vmem>>, vector<8x8x8xbf16>
    %83 = vector.shape_cast %82 : vector<8x8x8xbf16> to vector<64x8xbf16>
    %c7 = arith.constant 7 : index
    %c0_80 = arith.constant 0 : index
    %c0_81 = arith.constant 0 : index
    %84 = vector.load %arg4[%c7, %c0_80, %c0_81] : memref<9x8x8xbf16, #tpu.memory_space<vmem>>, vector<1x8x8xbf16>
    %85 = vector.shape_cast %84 : vector<1x8x8xbf16> to vector<8x8xbf16>
    %cst_82 = arith.constant dense<0.000000e+00> : vector<64x8xf32>
    %86 = tpu.matmul %83, %85, %cst_82 {dimension_numbers = #tpu.dot_dimension_numbers<[1], [0], [0], [1], [0, 0, 1, 1], [], []>} : vector<64x8xbf16>, vector<8x8xbf16>, vector<64x8xf32> -> vector<64x8xf32>
    %87 = arith.addf %81, %86 : vector<64x8xf32>
    %c2_83 = arith.constant 2 : index
    %c2_84 = arith.constant 2 : index
    %c0_85 = arith.constant 0 : index
    %88 = vector.load %arg9[%c2_83, %c2_84, %c0_85] : memref<10x10x8xbf16, #tpu.memory_space<vmem>>, vector<8x8x8xbf16>
    %89 = vector.shape_cast %88 : vector<8x8x8xbf16> to vector<64x8xbf16>
    %c8 = arith.constant 8 : index
    %c0_86 = arith.constant 0 : index
    %c0_87 = arith.constant 0 : index
    %90 = vector.load %arg4[%c8, %c0_86, %c0_87] : memref<9x8x8xbf16, #tpu.memory_space<vmem>>, vector<1x8x8xbf16>
    %91 = vector.shape_cast %90 : vector<1x8x8xbf16> to vector<8x8xbf16>
    %cst_88 = arith.constant dense<0.000000e+00> : vector<64x8xf32>
    %92 = tpu.matmul %89, %91, %cst_88 {dimension_numbers = #tpu.dot_dimension_numbers<[1], [0], [0], [1], [0, 0, 1, 1], [], []>} : vector<64x8xbf16>, vector<8x8xbf16>, vector<64x8xf32> -> vector<64x8xf32>
    %93 = arith.addf %87, %92 : vector<64x8xf32>
    %c0_89 = arith.constant 0 : index
    %c0_90 = arith.constant 0 : index
    %94 = vector.load %arg5[%c0_89, %c0_90] : memref<1x8xf32, #tpu.memory_space<vmem>>, vector<1x8xf32>
    %95 = vector.broadcast %94 : vector<1x8xf32> to vector<64x8xf32>
    %96 = arith.addf %93, %95 : vector<64x8xf32>
    %cst_91 = arith.constant 0.000000e+00 : f32
    %97 = vector.broadcast %cst_91 : f32 to vector<64x8xf32>
    %98 = arith.maximumf %96, %97 : vector<64x8xf32>
    %99 = vector.shape_cast %98 : vector<64x8xf32> to vector<8x8x8xf32>
    %100 = arith.truncf %99 : vector<8x8x8xf32> to vector<8x8x8xbf16>
    %c1_92 = arith.constant 1 : index
    %c1_93 = arith.constant 1 : index
    %c0_94 = arith.constant 0 : index
    %101 = vector.load %arg10[%c1_92, %c1_93, %c0_94] : memref<10x10x8xbf16, #tpu.memory_space<vmem>>, vector<8x8x8xbf16>
    tpu.vector_store %arg10[%c1_92, %c1_93, %c0_94], %100 {strides = array<i32>} : memref<10x10x8xbf16, #tpu.memory_space<vmem>>, vector<8x8x8xbf16>,
    %cst_95 = arith.constant 0.000000e+00 : f32
    %102 = vector.broadcast %cst_95 : f32 to vector<64x8xf32>
    %c0_96 = arith.constant 0 : index
    %c0_97 = arith.constant 0 : index
    %c0_98 = arith.constant 0 : index
    %103 = vector.load %arg10[%c0_96, %c0_97, %c0_98] : memref<10x10x8xbf16, #tpu.memory_space<vmem>>, vector<8x8x8xbf16>
    %104 = vector.shape_cast %103 : vector<8x8x8xbf16> to vector<64x8xbf16>
    %c0_99 = arith.constant 0 : index
    %c0_100 = arith.constant 0 : index
    %c0_101 = arith.constant 0 : index
    %105 = vector.load %arg6[%c0_99, %c0_100, %c0_101] : memref<9x8x8xbf16, #tpu.memory_space<vmem>>, vector<1x8x8xbf16>
    %106 = vector.shape_cast %105 : vector<1x8x8xbf16> to vector<8x8xbf16>
    %cst_102 = arith.constant dense<0.000000e+00> : vector<64x8xf32>
    %107 = tpu.matmul %104, %106, %cst_102 {dimension_numbers = #tpu.dot_dimension_numbers<[1], [0], [0], [1], [0, 0, 1, 1], [], []>} : vector<64x8xbf16>, vector<8x8xbf16>, vector<64x8xf32> -> vector<64x8xf32>
    %108 = arith.addf %102, %107 : vector<64x8xf32>
    %c0_103 = arith.constant 0 : index
    %c1_104 = arith.constant 1 : index
    %c0_105 = arith.constant 0 : index
    %109 = vector.load %arg10[%c0_103, %c1_104, %c0_105] : memref<10x10x8xbf16, #tpu.memory_space<vmem>>, vector<8x8x8xbf16>
    %110 = vector.shape_cast %109 : vector<8x8x8xbf16> to vector<64x8xbf16>
    %c1_106 = arith.constant 1 : index
    %c0_107 = arith.constant 0 : index
    %c0_108 = arith.constant 0 : index
    %111 = vector.load %arg6[%c1_106, %c0_107, %c0_108] : memref<9x8x8xbf16, #tpu.memory_space<vmem>>, vector<1x8x8xbf16>
    %112 = vector.shape_cast %111 : vector<1x8x8xbf16> to vector<8x8xbf16>
    %cst_109 = arith.constant dense<0.000000e+00> : vector<64x8xf32>
    %113 = tpu.matmul %110, %112, %cst_109 {dimension_numbers = #tpu.dot_dimension_numbers<[1], [0], [0], [1], [0, 0, 1, 1], [], []>} : vector<64x8xbf16>, vector<8x8xbf16>, vector<64x8xf32> -> vector<64x8xf32>
    %114 = arith.addf %108, %113 : vector<64x8xf32>
    %c0_110 = arith.constant 0 : index
    %c2_111 = arith.constant 2 : index
    %c0_112 = arith.constant 0 : index
    %115 = vector.load %arg10[%c0_110, %c2_111, %c0_112] : memref<10x10x8xbf16, #tpu.memory_space<vmem>>, vector<8x8x8xbf16>
    %116 = vector.shape_cast %115 : vector<8x8x8xbf16> to vector<64x8xbf16>
    %c2_113 = arith.constant 2 : index
    %c0_114 = arith.constant 0 : index
    %c0_115 = arith.constant 0 : index
    %117 = vector.load %arg6[%c2_113, %c0_114, %c0_115] : memref<9x8x8xbf16, #tpu.memory_space<vmem>>, vector<1x8x8xbf16>
    %118 = vector.shape_cast %117 : vector<1x8x8xbf16> to vector<8x8xbf16>
    %cst_116 = arith.constant dense<0.000000e+00> : vector<64x8xf32>
    %119 = tpu.matmul %116, %118, %cst_116 {dimension_numbers = #tpu.dot_dimension_numbers<[1], [0], [0], [1], [0, 0, 1, 1], [], []>} : vector<64x8xbf16>, vector<8x8xbf16>, vector<64x8xf32> -> vector<64x8xf32>
    %120 = arith.addf %114, %119 : vector<64x8xf32>
    %c1_117 = arith.constant 1 : index
    %c0_118 = arith.constant 0 : index
    %c0_119 = arith.constant 0 : index
    %121 = vector.load %arg10[%c1_117, %c0_118, %c0_119] : memref<10x10x8xbf16, #tpu.memory_space<vmem>>, vector<8x8x8xbf16>
    %122 = vector.shape_cast %121 : vector<8x8x8xbf16> to vector<64x8xbf16>
    %c3_120 = arith.constant 3 : index
    %c0_121 = arith.constant 0 : index
    %c0_122 = arith.constant 0 : index
    %123 = vector.load %arg6[%c3_120, %c0_121, %c0_122] : memref<9x8x8xbf16, #tpu.memory_space<vmem>>, vector<1x8x8xbf16>
    %124 = vector.shape_cast %123 : vector<1x8x8xbf16> to vector<8x8xbf16>
    %cst_123 = arith.constant dense<0.000000e+00> : vector<64x8xf32>
    %125 = tpu.matmul %122, %124, %cst_123 {dimension_numbers = #tpu.dot_dimension_numbers<[1], [0], [0], [1], [0, 0, 1, 1], [], []>} : vector<64x8xbf16>, vector<8x8xbf16>, vector<64x8xf32> -> vector<64x8xf32>
    %126 = arith.addf %120, %125 : vector<64x8xf32>
    %c1_124 = arith.constant 1 : index
    %c1_125 = arith.constant 1 : index
    %c0_126 = arith.constant 0 : index
    %127 = vector.load %arg10[%c1_124, %c1_125, %c0_126] : memref<10x10x8xbf16, #tpu.memory_space<vmem>>, vector<8x8x8xbf16>
    %128 = vector.shape_cast %127 : vector<8x8x8xbf16> to vector<64x8xbf16>
    %c4_127 = arith.constant 4 : index
    %c0_128 = arith.constant 0 : index
    %c0_129 = arith.constant 0 : index
    %129 = vector.load %arg6[%c4_127, %c0_128, %c0_129] : memref<9x8x8xbf16, #tpu.memory_space<vmem>>, vector<1x8x8xbf16>
    %130 = vector.shape_cast %129 : vector<1x8x8xbf16> to vector<8x8xbf16>
    %cst_130 = arith.constant dense<0.000000e+00> : vector<64x8xf32>
    %131 = tpu.matmul %128, %130, %cst_130 {dimension_numbers = #tpu.dot_dimension_numbers<[1], [0], [0], [1], [0, 0, 1, 1], [], []>} : vector<64x8xbf16>, vector<8x8xbf16>, vector<64x8xf32> -> vector<64x8xf32>
    %132 = arith.addf %126, %131 : vector<64x8xf32>
    %c1_131 = arith.constant 1 : index
    %c2_132 = arith.constant 2 : index
    %c0_133 = arith.constant 0 : index
    %133 = vector.load %arg10[%c1_131, %c2_132, %c0_133] : memref<10x10x8xbf16, #tpu.memory_space<vmem>>, vector<8x8x8xbf16>
    %134 = vector.shape_cast %133 : vector<8x8x8xbf16> to vector<64x8xbf16>
    %c5_134 = arith.constant 5 : index
    %c0_135 = arith.constant 0 : index
    %c0_136 = arith.constant 0 : index
    %135 = vector.load %arg6[%c5_134, %c0_135, %c0_136] : memref<9x8x8xbf16, #tpu.memory_space<vmem>>, vector<1x8x8xbf16>
    %136 = vector.shape_cast %135 : vector<1x8x8xbf16> to vector<8x8xbf16>
    %cst_137 = arith.constant dense<0.000000e+00> : vector<64x8xf32>
    %137 = tpu.matmul %134, %136, %cst_137 {dimension_numbers = #tpu.dot_dimension_numbers<[1], [0], [0], [1], [0, 0, 1, 1], [], []>} : vector<64x8xbf16>, vector<8x8xbf16>, vector<64x8xf32> -> vector<64x8xf32>
    %138 = arith.addf %132, %137 : vector<64x8xf32>
    %c2_138 = arith.constant 2 : index
    %c0_139 = arith.constant 0 : index
    %c0_140 = arith.constant 0 : index
    %139 = vector.load %arg10[%c2_138, %c0_139, %c0_140] : memref<10x10x8xbf16, #tpu.memory_space<vmem>>, vector<8x8x8xbf16>
    %140 = vector.shape_cast %139 : vector<8x8x8xbf16> to vector<64x8xbf16>
    %c6_141 = arith.constant 6 : index
    %c0_142 = arith.constant 0 : index
    %c0_143 = arith.constant 0 : index
    %141 = vector.load %arg6[%c6_141, %c0_142, %c0_143] : memref<9x8x8xbf16, #tpu.memory_space<vmem>>, vector<1x8x8xbf16>
    %142 = vector.shape_cast %141 : vector<1x8x8xbf16> to vector<8x8xbf16>
    %cst_144 = arith.constant dense<0.000000e+00> : vector<64x8xf32>
    %143 = tpu.matmul %140, %142, %cst_144 {dimension_numbers = #tpu.dot_dimension_numbers<[1], [0], [0], [1], [0, 0, 1, 1], [], []>} : vector<64x8xbf16>, vector<8x8xbf16>, vector<64x8xf32> -> vector<64x8xf32>
    %144 = arith.addf %138, %143 : vector<64x8xf32>
    %c2_145 = arith.constant 2 : index
    %c1_146 = arith.constant 1 : index
    %c0_147 = arith.constant 0 : index
    %145 = vector.load %arg10[%c2_145, %c1_146, %c0_147] : memref<10x10x8xbf16, #tpu.memory_space<vmem>>, vector<8x8x8xbf16>
    %146 = vector.shape_cast %145 : vector<8x8x8xbf16> to vector<64x8xbf16>
    %c7_148 = arith.constant 7 : index
    %c0_149 = arith.constant 0 : index
    %c0_150 = arith.constant 0 : index
    %147 = vector.load %arg6[%c7_148, %c0_149, %c0_150] : memref<9x8x8xbf16, #tpu.memory_space<vmem>>, vector<1x8x8xbf16>
    %148 = vector.shape_cast %147 : vector<1x8x8xbf16> to vector<8x8xbf16>
    %cst_151 = arith.constant dense<0.000000e+00> : vector<64x8xf32>
    %149 = tpu.matmul %146, %148, %cst_151 {dimension_numbers = #tpu.dot_dimension_numbers<[1], [0], [0], [1], [0, 0, 1, 1], [], []>} : vector<64x8xbf16>, vector<8x8xbf16>, vector<64x8xf32> -> vector<64x8xf32>
    %150 = arith.addf %144, %149 : vector<64x8xf32>
    %c2_152 = arith.constant 2 : index
    %c2_153 = arith.constant 2 : index
    %c0_154 = arith.constant 0 : index
    %151 = vector.load %arg10[%c2_152, %c2_153, %c0_154] : memref<10x10x8xbf16, #tpu.memory_space<vmem>>, vector<8x8x8xbf16>
    %152 = vector.shape_cast %151 : vector<8x8x8xbf16> to vector<64x8xbf16>
    %c8_155 = arith.constant 8 : index
    %c0_156 = arith.constant 0 : index
    %c0_157 = arith.constant 0 : index
    %153 = vector.load %arg6[%c8_155, %c0_156, %c0_157] : memref<9x8x8xbf16, #tpu.memory_space<vmem>>, vector<1x8x8xbf16>
    %154 = vector.shape_cast %153 : vector<1x8x8xbf16> to vector<8x8xbf16>
    %cst_158 = arith.constant dense<0.000000e+00> : vector<64x8xf32>
    %155 = tpu.matmul %152, %154, %cst_158 {dimension_numbers = #tpu.dot_dimension_numbers<[1], [0], [0], [1], [0, 0, 1, 1], [], []>} : vector<64x8xbf16>, vector<8x8xbf16>, vector<64x8xf32> -> vector<64x8xf32>
    %156 = arith.addf %150, %155 : vector<64x8xf32>
    %c0_159 = arith.constant 0 : index
    %c0_160 = arith.constant 0 : index
    %157 = vector.load %arg7[%c0_159, %c0_160] : memref<1x8xf32, #tpu.memory_space<vmem>>, vector<1x8xf32>
    %158 = vector.broadcast %157 : vector<1x8xf32> to vector<64x8xf32>
    %159 = arith.addf %156, %158 : vector<64x8xf32>
    %cst_161 = arith.constant 0.000000e+00 : f32
    %160 = vector.broadcast %cst_161 : f32 to vector<64x8xf32>
    %161 = arith.maximumf %159, %160 : vector<64x8xf32>
    %c0_162 = arith.constant 0 : index
    %c0_163 = arith.constant 0 : index
    %c0_164 = arith.constant 0 : index
    %162 = vector.load %arg8[%c0_162, %c0_163, %c0_164] : memref<1x64x8xf32, #tpu.memory_space<vmem>>, vector<1x64x8xf32>
    %163 = vector.shape_cast %162 : vector<1x64x8xf32> to vector<64x8xf32>
    %164 = vector.shape_cast %161 : vector<64x8xf32> to vector<1x64x8xf32>
    tpu.vector_store %arg8[%c0_162, %c0_163, %c0_164], %164 {strides = array<i32>} : memref<1x64x8xf32, #tpu.memory_space<vmem>>, vector<1x64x8xf32>,
    return
  }
  func.func @transform_0(%arg0: i32) -> (i32, i32, i32, i32) {
    %c0_i32 = arith.constant 0 : i32
    %c0_i32_0 = arith.constant 0 : i32
    %c0_i32_1 = arith.constant 0 : i32
    %c0_i32_2 = arith.constant 0 : i32
    return %arg0, %c0_i32, %c0_i32_0, %c0_i32_1 : i32, i32, i32, i32
  }
  func.func @transform_1(%arg0: i32) -> (i32, i32, i32) {
    %c0_i32 = arith.constant 0 : i32
    %c0_i32_0 = arith.constant 0 : i32
    %c0_i32_1 = arith.constant 0 : i32
    %c0_i32_2 = arith.constant 0 : i32
    return %c0_i32, %c0_i32_0, %c0_i32_1 : i32, i32, i32
  }
  func.func @transform_2(%arg0: i32) -> (i32, i32) {
    %c0_i32 = arith.constant 0 : i32
    %c0_i32_0 = arith.constant 0 : i32
    %c0_i32_1 = arith.constant 0 : i32
    return %c0_i32, %c0_i32_0 : i32, i32
  }
  func.func @transform_3(%arg0: i32) -> (i32, i32, i32) {
    %c0_i32 = arith.constant 0 : i32
    %c0_i32_0 = arith.constant 0 : i32
    %c0_i32_1 = arith.constant 0 : i32
    %c0_i32_2 = arith.constant 0 : i32
    return %c0_i32, %c0_i32_0, %c0_i32_1 : i32, i32, i32
  }
  func.func @transform_4(%arg0: i32) -> (i32, i32) {
    %c0_i32 = arith.constant 0 : i32
    %c0_i32_0 = arith.constant 0 : i32
    %c0_i32_1 = arith.constant 0 : i32
    return %c0_i32, %c0_i32_0 : i32, i32
  }
  func.func @transform_5(%arg0: i32) -> (i32, i32, i32) {
    %c0_i32 = arith.constant 0 : i32
    %c0_i32_0 = arith.constant 0 : i32
    %c0_i32_1 = arith.constant 0 : i32
    %c0_i32_2 = arith.constant 0 : i32
    return %c0_i32, %c0_i32_0, %c0_i32_1 : i32, i32, i32
  }
  func.func @transform_6(%arg0: i32) -> (i32, i32) {
    %c0_i32 = arith.constant 0 : i32
    %c0_i32_0 = arith.constant 0 : i32
    %c0_i32_1 = arith.constant 0 : i32
    return %c0_i32, %c0_i32_0 : i32, i32
  }
  func.func @transform_7(%arg0: i32) -> (i32, i32, i32) {
    %c0_i32 = arith.constant 0 : i32
    %c0_i32_0 = arith.constant 0 : i32
    %c0_i32_1 = arith.constant 0 : i32
    return %arg0, %c0_i32, %c0_i32_0 : i32, i32, i32
  }
}

</mosaic_0001>

<bundles_post_ra>
// kernel: down_block.1
= control target key start
LH: loop header
LB: loop body
LE: loop exit
PB: predicated region body
PF: predicated region fallthrough
CT: control target
= control target key end

     0   :  { %s5216_s24 = smov 0   ;;  %s6211_s0 = inlined_call_operand.vmem [shape: bf16[2,9,9,16], index: 0, kind: input, shape index: {}]   ;;  %s6212_s1 = inlined_call_operand.vmem [shape: bf16[4,16,8], index: 1, kind: input, shape index: {}]   ;;  %s6213_s2 = inlined_call_operand.vmem [shape: f32[1,8], index: 2, kind: input, shape index: {}]   ;;  %s6214_s3 = inlined_call_operand.vmem [shape: bf16[9,8,8], index: 3, kind: input, shape index: {}]   ;;  %s6215_s4 = inlined_call_operand.vmem [shape: f32[1,8], index: 4, kind: input, shape index: {}]   ;;  %s6216_s5 = inlined_call_operand.vmem [shape: bf16[9,8,8], index: 5, kind: input, shape index: {}]   ;;  %s6217_s6 = inlined_call_operand.vmem [shape: f32[1,8], index: 6, kind: input, shape index: {}]   ;;  %s6218_s7 = inlined_call_operand.vmem [shape: f32[2,64,8], index: 7, kind: output, shape index: {}]  }
   0x1 LB: > { %s4325_s25 = sadd.s32 4294967295, %s5173_s24   ;;  %p4329_p0 = scmp.ge.s32.totalorder %s5173_s24, 1  ;;  %s5173_s24 = sphi %s5216_s24, %s17_s24  }
   0x2   : > { %p237_p1 = scmp.lt.s32.totalorder %s5173_s24, 3 }
   0x4   : > { %p238_p2 = pnand %p4329_p0, %p237_p1 }
   0x5   : > { %v5131_v0 = vld [vmem:[%s6212_s1 + $0x10] sm:$0xff] (!%p238_p2)   ;;  %p269_p3 = scmp.lt.s32.totalorder (!%p238_p2), %s4325_s25, 1  ;;  %v5135_v1 = vld [vmem:[%s6212_s1 + $0x8] sm:$0xff] (!%p238_p2)   ;;  %v5235_v2 = vld [vmem:[%s6212_s1] sm:$0xff] (!%p238_p2)   ;;  %vm478_vm0 = vcmask (!%p238_p2), 130048   ;;  %vm280_vm4 = vcmask (!%p238_p2), 60416  }
   0x6   : > { %241 = sbr.rel (%p238_p2) target bundleno = 1048 (0x418), region = 48  ;;  %4751 = vmatprep.subr.bf16.mxu0 (!%p238_p2), %v5131_v0  ;;  %4731 = vmatprep.subr.bf16.mxu1 (!%p238_p2), %v5135_v1  ;;  %v5139_v3 = vld [vmem:[%s6212_s1 + $0x18] sm:$0xff] (!%p238_p2)   ;;  %vm342_vm1 = vsmask.f32 (!%p238_p2), 3328  ;;  %vm343_vm2 = vsmask.f32 (!%p238_p2), 7440 }
   0x7   : > { %4752 = vmatpush3.bf16.msra.mxu0 (!%p238_p2), %v5131_v0  ;;  %4732 = vmatpush3.bf16.msra.mxu1 (!%p238_p2), %v5135_v1  ;;  %vm5296_vm3 = vmor (!%p238_p2), %vm342_vm1, %vm343_vm2  ;;  %vm282_vm5 = vcmask (!%p238_p2), 57344   ;;  %vm1218_vm6 = vcmask (!%p238_p2), 1043456   ;;  %vm1009_vm7 = vsmask.f32 (!%p238_p2), 7938  ;;  %vm1015_vm8 = vsmask.f32 (!%p238_p2), 256 }
   0x8   : > { %4741 = vmatprep.subr.bf16.mxu1 (!%p238_p2), %v5235_v2  ;;  %4761 = vmatprep.subr.bf16.mxu0 (!%p238_p2), %v5139_v3  ;;  %vm5437_vm9 = vmand (!%p238_p2), %vm280_vm4, %vm1009_vm7  ;;  %vm1205_vm11 = vcmask (!%p238_p2), 64512   ;;  %vm1411_vm12 = vcmask (!%p238_p2), 1042432   ;;  %vm1412_vm13 = vcmask (!%p238_p2), 1046532  }
   0x9   : > { %vm5444_vm10 = vmand (!%p238_p2), %vm282_vm5, %vm1015_vm8 }
   0xa   : > { %vm5587_vm14 = vmor (!%p238_p2), %vm1411_vm12, %vm1412_vm13 }
   0xd   : > { %s6228_s25 = smov (!%p269_p3, %s4325_s25), 1 }
   0xe   : > { %s5121_s9 = smul.u32 72, %s6228_s25  ;;  %s4604_s15 = sshll.u32 %s6228_s25, 6 }
   0xf   : > { %s278_s18 = scalar_lea.vmem %s6218_s7, %s4604_s15 }
  0x10   : > { %s5245_s14 = scalar_lea.vmem %s6211_s0, %s5121_s9 }
  0x11   : > { %v5248_v4 = vld [vmem:[%s5245_s14 + $0x8] sm:$0xf]  ;;  %v5251_v5 = vld [vmem:[%s5245_s14 + $0x10] sm:$0xf]  ;;  %v5254_v6 = vld [vmem:[%s5245_s14 + $0x18] sm:$0xf] }
  0x12   : > { %v374_v7 = vshrl.u32 %v5251_v5, 16  ;;  %v377_v8 = vshll.u32 %v5251_v5, 16  ;;  %v5259_v9 = vld [vmem:[%s5245_s14 + $0x20] sm:$0xf]  ;;  %v360_v10 = vshrl.u32 %v5248_v4, 16  ;;  %v363_v11 = vshll.u32 %v5248_v4, 16 }
  0x13   : > { %v4355_v12 = vcombine.low %v5248_v4, %v5251_v5  ;;  %v5266_v13 = vld [vmem:[%s5245_s14 + $0x28] sm:$0xf]  ;;  %v5269_v14 = vld [vmem:[%s5245_s14 + $0x30] sm:$0xf]  ;;  %v402_v17 = vshrl.u32 %v5259_v9, 16  ;;  %v4356_v18 = vcombine.low %v5254_v6, %v5259_v9  ;;  %v405_v20 = vshll.u32 %v5259_v9, 16 }
  0x14   : > { %v376_v15 = vrot.slane %v374_v7, 4  ;;  %v379_v16 = vrot.slane %v377_v8, 5  ;;  %v5275_v19 = vld [vmem:[%s5245_s14] sm:$0xf]  ;;  %v416_v21 = vshrl.u32 %v5266_v13, 16  ;;  %v419_v22 = vshll.u32 %v5266_v13, 16 }
  0x15   : > { %4753 = vmatprep.mubr.msk.bf16.mxu0 %vm478_vm0, %v4355_v12  ;;  %v4357_v23 = vcombine.low %v5266_v13, %v5269_v14  ;;  %v323_v24 = vld [vmem:[%s5245_s14 + $0x4] sm:$0x1]  ;;  %v430_v25 = vshrl.u32 %v5269_v14, 16  ;;  %v433_v26 = vshll.u32 %v5269_v14, 16  ;;  %v325_v27 = vld [vmem:[%s5245_s14 + $0xc] sm:$0x1] }
  0x16   : > { %4754 = vmatmul.mubr.msk.bf16.vlgmr.msra.gmra.mrb[0].mxu0 %vm478_vm0, %v4356_v18  ;;  %v327_v28 = vld [vmem:[%s5245_s14 + $0x14] sm:$0x1]  ;;  %v380_v29 = vor.u32 %v379_v16, %v376_v15  ;;  %v346_v30 = vshrl.u32 %v5275_v19, 16  ;;  %v349_v31 = vshll.u32 %v5275_v19, 16  ;;  %v355_v32 = vshll.u32 %v323_v24, 16 }
  0x17   : > { %4757 = vmatprep.mubr.msk.bf16.mxu0 %vm478_vm0, %v4357_v23  ;;  %v362_v33 = vrot.slane %v360_v10, 4  ;;  %4762 = vmatpush3.bf16.msra.mxu0 %v5139_v3  ;;  %v329_v34 = vld [vmem:[%s5245_s14 + $0x1c] sm:$0x1]  ;;  %v365_v35 = vrot.slane %v363_v11, 5  ;;  %v369_v36 = vshll.u32 %v325_v27, 16  ;;  %v383_v38 = vshll.u32 %v327_v28, 16 }
  0x18   : > { %v381_v37 = vrot.slane %v380_v29, 4  ;;  %v331_v39 = vld [vmem:[%s5245_s14 + $0x24] sm:$0x1]  ;;  %v348_v41 = vrot.slane %v346_v30, 4  ;;  %v351_v42 = vrot.slane %v349_v31, 5  ;;  %v357_v43 = vrot.slane %v355_v32, 5 }
  0x19   : > { %v388_v44 = vshrl.u32 %v5254_v6, 16  ;;  %v366_v45 = vor.u32 %v365_v35, %v362_v33  ;;  %v371_v46 = vrot.slane %v369_v36, 5  ;;  %v385_v47 = vrot.slane %v383_v38, 5  ;;  %v5303_v49 = vld [vmem:[%s5245_s14 + $0x38] sm:$0xf] }
  0x1a   : > { %v391_v48 = vshll.u32 %v5254_v6, 16  ;;  %v352_v50 = vor.u32 %v351_v42, %v348_v41  ;;  %v397_v52 = vshll.u32 %v329_v34, 16  ;;  %v404_v53 = vrot.slane %v402_v17, 4  ;;  %v338_v58 = vld [vmem:[%s5245_s14 + $0x40] sm:$0xf] }
  0x1b   : > { %v390_v51 = vrot.slane %v388_v44, 4  ;;  %v367_v54 = vrot.slane %v366_v45, 4  ;;  %v386_v55 = vsel %vm5296_vm3, %v381_v37, %v385_v47  ;;  %v407_v57 = vrot.slane %v405_v20, 5  ;;  %v333_v7 = vld [vmem:[%s5245_s14 + $0x2c] sm:$0x1] }
  0x1c   : > { %v393_v56 = vrot.slane %v391_v48, 5  ;;  %v353_v59 = vrot.slane %v352_v50, 4  ;;  %v399_v60 = vrot.slane %v397_v52, 5  ;;  %v411_v61 = vshll.u32 %v331_v39, 16  ;;  %v335_v28 = vld [vmem:[%s5245_s14 + $0x34] sm:$0x1] }
  0x1d   : > { %v444_v62 = vshrl.u32 %v5303_v49, 16  ;;  %v372_v63 = vsel %vm5296_vm3, %v367_v54, %v371_v46  ;;  %v408_v1 = vor.u32 %v407_v57, %v404_v53  ;;  %v447_v3 = vshll.u32 %v5303_v49, 16  ;;  %v337_v32 = vld [vmem:[%s5245_s14 + $0x3c] sm:$0x1]  ;;  %v339_v36 = vld [vmem:[%s5245_s14 + $0x44] sm:$0x1] }
  0x1e   : > { %v394_v0 = vor.u32 %v393_v56, %v390_v51  ;;  %v358_v8 = vsel %vm5296_vm3, %v353_v59, %v357_v43  ;;  %v413_v10 = vrot.slane %v411_v61, 5  ;;  %v4366_v11 = vcombine.low %v372_v63, %v386_v55 }
  0x1f   : > { %v4358_v12 = vcombine.low %v5303_v49, %v338_v58  ;;  %v409_v16 = vrot.slane %v408_v1, 4  ;;  %v4335_v17 = vcombine.low %v358_v8, %v372_v63  ;;  %v760_v18 = vshrl.u32 %v338_v58, 16 }
  0x20   : > { %v395_v15 = vrot.slane %v394_v0, 4  ;;  %v763_v20 = vshll.u32 %v338_v58, 16  ;;  %v418_v23 = vrot.slane %v416_v21, 4  ;;  %v421_v24 = vrot.slane %v419_v22, 5 }
  0x21   : > { %4758 = vmatmul.mubr.msk.bf16.gmra.mrb[4].mxu0 %vm478_vm0, %v4358_v12  ;;  %v425_v27 = vshll.u32 %v333_v7, 16  ;;  %v414_v30 = vsel %vm5296_vm3, %v409_v16, %v413_v10  ;;  %4733 = vmatprep.mubr.msk.bf16.mxu1 %vm478_vm0, %v4335_v17  ;;  %v762_v31 = vrot.slane %v760_v18, 4  ;;  %v432_v33 = vrot.slane %v430_v25, 4  ;;  %v5418_v12 = vld [vmem:[%s6213_s2] ss:$0 sm:$0xff] }
  0x22   : > { %v400_v29 = vsel %vm5296_vm3, %v395_v15, %v399_v60  ;;  %4763 = vmatprep.mubr.msk.bf16.mxu0 %vm478_vm0, %v4366_v11  ;;  %v765_v22 = vrot.slane %v763_v20, 5  ;;  %v422_v35 = vor.u32 %v421_v24, %v418_v23  ;;  %v435_v38 = vrot.slane %v433_v26, 5 }
  0x23   : > { %v4336_v34 = vcombine.low %v386_v55, %v400_v29  ;;  %v4367_v21 = vcombine.low %v400_v29, %v414_v30  ;;  %v427_v37 = vrot.slane %v425_v27, 5  ;;  %v439_v39 = vshll.u32 %v335_v28, 16 }
  0x24   : > { %v446_v41 = vrot.slane %v444_v62, 4  ;;  %v423_v42 = vrot.slane %v422_v35, 4  ;;  %v449_v43 = vrot.slane %v447_v3, 5  ;;  %v453_v44 = vshll.u32 %v337_v32, 16 }
  0x25   : > { %4734 = vmatmul.mubr.msk.bf16.vlgmr.msra.gmra.mrb[0].mxu1 %vm478_vm0, %v4336_v34  ;;  %v766_v45 = vor.u32 %v765_v22, %v762_v31  ;;  %v436_v25 = vor.u32 %v435_v38, %v432_v33  ;;  %v441_v46 = vrot.slane %v439_v39, 5  ;;  %v769_v47 = vshll.u32 %v339_v36, 16 }
  0x26   : > { %4742 = vmatpush3.bf16.msra.mxu1 %v5235_v2  ;;  %v428_v48 = vsel %vm5296_vm3, %v423_v42, %v427_v37  ;;  %v450_v50 = vor.u32 %v449_v43, %v446_v41  ;;  %v455_v51 = vrot.slane %v453_v44, 5  ;;  %v4344_v59 = vcombine.low %v5275_v19, %v5248_v4 }
  0x27   : > { %v767_v52 = vrot.slane %v766_v45, 4  ;;  %v4337_v26 = vcombine.low %v414_v30, %v428_v48  ;;  %v437_v53 = vrot.slane %v436_v25, 4  ;;  %v771_v54 = vrot.slane %v769_v47, 5 }
  0x28   : > { %v451_v55 = vrot.slane %v450_v50, 4  ;;  %v4345_v62 = vcombine.low %v5251_v5, %v5254_v6  ;;  %v4346_v63 = vcombine.low %v5259_v9, %v5266_v13  ;;  %v4347_v4 = vcombine.low %v5269_v14, %v5303_v49  ;;  %v4384_v5 = vld [vmem:[%s6214_s3 + $0x4] sm:$0xf]  ;;  %v5405_v9 = vld [vmem:[%s6214_s3] sm:$0xf] }
  0x29   : > { %4764 = vmatmul.mubr.msk.bf16.vlgmr.msra.gmra.mrb[0].mxu0 %vm478_vm0, %v4367_v21  ;;  %4737 = vmatprep.mubr.msk.bf16.mxu1 %vm478_vm0, %v4337_v26  ;;  %v442_v2 = vsel %vm5296_vm3, %v437_v53, %v441_v46  ;;  %v772_v56 = vsel %vm5296_vm3, %v767_v52, %v771_v54  ;;  %v5175_v19 = vmov 0   ;;  %v1220_v6 = vsel %vm1218_vm6, %v4384_v5, 0 }
  0x2a   : > { %v456_v57 = vsel %vm5296_vm3, %v451_v55, %v455_v51  ;;  %v4368_v58 = vcombine.low %v428_v48, %v442_v2  ;;  %288 = vst.msk [vmem:[#allocation2 + $0x18] sm:$0xf] %vm280_vm4, %v5175_v19  ;;  %281 = vst.msk [vmem:[#allocation2] sm:$0xf] %vm280_vm4, %v5175_v19  ;;  %5103 = vmatprep.subr.msk.bf16.mxu1 %vm1218_vm6, %v4384_v5 }
  0x2b   : > { %v4338_v60 = vcombine.low %v442_v2, %v456_v57  ;;  %v4369_v61 = vcombine.low %v456_v57, %v772_v56  ;;  %289 = vst.msk [vmem:[#allocation2 + $0x1c] sm:$0x1] %vm282_vm5, %v5175_v19  ;;  %283 = vst.msk [vmem:[#allocation2 + $0x4] sm:$0x1] %vm282_vm5, %v5175_v19 }
  0x2c   : > { %4767 = vmatprep.mubr.msk.bf16.mxu0 %vm478_vm0, %v4368_v58  ;;  %284 = vst.msk [vmem:[#allocation2 + $0x8] sm:$0xf] %vm280_vm4, %v5175_v19  ;;  %286 = vst.msk [vmem:[#allocation2 + $0x10] sm:$0xf] %vm280_vm4, %v5175_v19 }
  0x2d   : > { %4738 = vmatmul.mubr.msk.bf16.gmra.mrb[4].mxu1 %vm478_vm0, %v4338_v60  ;;  %285 = vst.msk [vmem:[#allocation2 + $0xc] sm:$0x1] %vm282_vm5, %v5175_v19  ;;  %287 = vst.msk [vmem:[#allocation2 + $0x14] sm:$0x1] %vm282_vm5, %v5175_v19 }
  0x2e   : > { %4743 = vmatprep.mubr.msk.bf16.mxu1 %vm478_vm0, %v4344_v59  ;;  %290 = vst.msk [vmem:[#allocation2 + $0x20] sm:$0xf] %vm280_vm4, %v5175_v19  ;;  %292 = vst.msk [vmem:[#allocation2 + $0x28] sm:$0xf] %vm280_vm4, %v5175_v19 }
  0x2f   : > { %291 = vst.msk [vmem:[#allocation2 + $0x24] sm:$0x1] %vm282_vm5, %v5175_v19  ;;  %293 = vst.msk [vmem:[#allocation2 + $0x2c] sm:$0x1] %vm282_vm5, %v5175_v19 }
  0x30   : > { %294 = vst.msk [vmem:[#allocation2 + $0x30] sm:$0xf] %vm280_vm4, %v5175_v19  ;;  %296 = vst.msk [vmem:[#allocation2 + $0x38] sm:$0xf] %vm280_vm4, %v5175_v19 }
  0x31   : > { %4768 = vmatmul.mubr.msk.bf16.gmra.mrb[4].mxu0 %vm478_vm0, %v4369_v61  ;;  %295 = vst.msk [vmem:[#allocation2 + $0x34] sm:$0x1] %vm282_vm5, %v5175_v19  ;;  %297 = vst.msk [vmem:[#allocation2 + $0x3c] sm:$0x1] %vm282_vm5, %v5175_v19  ;;  %v5411_v8 = vld [vmem:[#allocation2] sm:$0xf] }
  0x32   : > { %298 = vst.msk [vmem:[#allocation2 + $0x40] sm:$0xf] %vm280_vm4, %v5175_v19  ;;  %300 = vst.msk [vmem:[#allocation2 + $0x48] sm:$0xf] %vm280_vm4, %v5175_v19  ;;  %v1080_v15 = vshrl.u32 %v5411_v8, 16  ;;  %v1083_v16 = vshll.u32 %v5411_v8, 16 }
  0x33   : > { %299 = vst.msk [vmem:[#allocation2 + $0x44] sm:$0x1] %vm282_vm5, %v5175_v19  ;;  %301 = vst.msk [vmem:[#allocation2 + $0x4c] sm:$0x1] %vm282_vm5, %v5175_v19  ;;  %v5430_v37 = vld [vmem:[#allocation2 + $0x4] sm:$0x1] }
  0x34   : > { %302 = vst.msk [vmem:[#allocation3] sm:$0xf] %vm280_vm4, %v5175_v19  ;;  %304 = vst.msk [vmem:[#allocation3 + $0x8] sm:$0xf] %vm280_vm4, %v5175_v19  ;;  %v5424_v31 = vrot.slane %v1080_v15, 4  ;;  %v5426_v32 = vrot.slane %v1083_v16, 5 }
  0x35   : > { %4744 = vmatmul.mubr.msk.bf16.vlgmr.msra.gmra.mrb[0].mxu1 %vm478_vm0, %v4345_v62  ;;  %303 = vst.msk [vmem:[#allocation3 + $0x4] sm:$0x1] %vm282_vm5, %v5175_v19  ;;  %305 = vst.msk [vmem:[#allocation3 + $0xc] sm:$0x1] %vm282_vm5, %v5175_v19  ;;  %v1089_v43 = vshll.u32 %v5430_v37, 16 }
  0x36   : > { %4747 = vmatprep.mubr.msk.bf16.mxu1 %vm478_vm0, %v4346_v63  ;;  %306 = vst.msk [vmem:[#allocation3 + $0x10] sm:$0xf] %vm280_vm4, %v5175_v19  ;;  %308 = vst.msk [vmem:[#allocation3 + $0x18] sm:$0xf] %vm280_vm4, %v5175_v19  ;;  %4772 = vmatpush3.bf16.msra.mxu1 %v1220_v6  ;;  %v1086_v42 = vor.u32 %v5426_v32, %v5424_v31  ;;  %v1026_v48 = vld [vmem:[#allocation2 + $0x18] sm:$0xf] }
  0x37   : > { %307 = vst.msk [vmem:[#allocation3 + $0x14] sm:$0x1] %vm282_vm5, %v5175_v19  ;;  %309 = vst.msk [vmem:[#allocation3 + $0x1c] sm:$0x1] %vm282_vm5, %v5175_v19  ;;  %5104 = vmatprep.subr.msk.bf16.mxu1 %vm1218_vm6, %v5405_v9  ;;  %v1029_v50 = vld [vmem:[#allocation2 + $0x1c] sm:$0x1] }
  0x38   : > { %310 = vst.msk [vmem:[#allocation3 + $0x20] sm:$0xf] %vm280_vm4, %v5175_v19  ;;  %312 = vst.msk [vmem:[#allocation3 + $0x28] sm:$0xf] %vm280_vm4, %v5175_v19  ;;  %v1011_v56 = vld [vmem:[#allocation2 + $0x8] sm:$0xf] }
  0x39   : > { %311 = vst.msk [vmem:[#allocation3 + $0x24] sm:$0x1] %vm282_vm5, %v5175_v19  ;;  %313 = vst.msk [vmem:[#allocation3 + $0x2c] sm:$0x1] %vm282_vm5, %v5175_v19  ;;  %v1017_v63 = vld [vmem:[#allocation2 + $0xc] sm:$0x1] }
  0x3a   : > { %314 = vst.msk [vmem:[#allocation3 + $0x30] sm:$0xf] %vm280_vm4, %v5175_v19  ;;  %316 = vst.msk [vmem:[#allocation3 + $0x38] sm:$0xf] %vm280_vm4, %v5175_v19 }
  0x3b   : > { %315 = vst.msk [vmem:[#allocation3 + $0x34] sm:$0x1] %vm282_vm5, %v5175_v19  ;;  %317 = vst.msk [vmem:[#allocation3 + $0x3c] sm:$0x1] %vm282_vm5, %v5175_v19 }
  0x3c   : > { %318 = vst.msk [vmem:[#allocation3 + $0x40] sm:$0xf] %vm280_vm4, %v5175_v19  ;;  %320 = vst.msk [vmem:[#allocation3 + $0x48] sm:$0xf] %vm280_vm4, %v5175_v19 }
  0x3d   : > { %4748 = vmatmul.mubr.msk.bf16.gmra.mrb[4].mxu1 %vm478_vm0, %v4347_v4  ;;  %319 = vst.msk [vmem:[#allocation3 + $0x44] sm:$0x1] %vm282_vm5, %v5175_v19  ;;  %321 = vst.msk [vmem:[#allocation3 + $0x4c] sm:$0x1] %vm282_vm5, %v5175_v19 }
  0xfc   : > { %v4765_v13 = vpop.f32.mrb[0].mxu0 }
  0xfd   : > { %v833_v14 = vpop.f32.mrb[1].mxu0 }
  0xfe   : > { %v4766_v49 = vpop.f32.mrb[2].mxu0 }
  0xff   : > { %v836_v0 = vpop.f32.mrb[3].mxu0 }
 0x104   : > { %v4769_v1 = vpop.f32.mrb[4].mxu0 }
 0x105   : > { %v849_v3 = vpop.f32.mrb[5].mxu0 }
 0x106   : > { %v5409_v7 = vpop.f32.mrb[6].mxu0 }
 0x107   : > { %v5413_v10 = vpop.f32.mrb[7].mxu0 }
 0x108   : > { %v4745_v11 = vpop.f32.mrb[0].mxu1 }
 0x109   : > { %v4951_v17 = vadd.f32 %v4765_v13, %v4745_v11  ;;  %v628_v18 = vpop.f32.mrb[1].mxu1  ;;  %v1035_v11 = vld [vmem:[#allocation2 + $0x24] sm:$0x1] }
 0x10a   : > { %v4952_v20 = vadd.f32 %v833_v14, %v628_v18  ;;  %v4746_v23 = vpop.f32.mrb[2].mxu1 }
 0x10b   : > { %v881_v24 = vadd.f32 %v4951_v17, %v5418_v12  ;;  %v4953_v27 = vadd.f32 %v4766_v49, %v4746_v23  ;;  %v631_v28 = vpop.f32.mrb[3].mxu1  ;;  %v1032_v49 = vld [vmem:[#allocation2 + $0x20] sm:$0xf] }
 0x10c   : > { %v879_v29 = vadd.f32 %v4952_v20, %v5418_v12  ;;  %v4954_v30 = vadd.f32 %v836_v0, %v631_v28 }
 0x10d   : > { %v889_v33 = vmax.f32 %v881_v24, 0.0  ;;  %v882_v34 = vadd.f32 %v4953_v27, %v5418_v12  ;;  %v1020_v24 = vld [vmem:[#allocation2 + $0x10] sm:$0xf]  ;;  %v1023_v27 = vld [vmem:[#allocation2 + $0x14] sm:$0x1] }
 0x10e   : > { %v887_v21 = vmax.f32 %v879_v29, 0.0  ;;  %v880_v22 = vadd.f32 %v4954_v30, %v5418_v12 }
 0x10f   : > { %v4607_v35 = vpack.c.bf16 %v889_v33, %v889_v33  ;;  %v890_v36 = vmax.f32 %v882_v34, 0.0 }
 0x110   : > { %v4605_v38 = vpack.c.bf16 %v887_v21, %v887_v21  ;;  %v888_v39 = vmax.f32 %v880_v22, 0.0  ;;  %v4749_v41 = vpop.f32.mrb[4].mxu1 }
 0x111   : > { %v944_v44 = vshrl.u32 %v4607_v35, 16  ;;  %v947_v45 = vshll.u32 %v4607_v35, 16  ;;  %v4608_v25 = vpack.c.bf16 %v890_v36, %v890_v36  ;;  %v4955_v46 = vadd.f32 %v4769_v1, %v4749_v41  ;;  %v644_v47 = vpop.f32.mrb[5].mxu1 }
 0x112   : > { %v928_v51 = vshrl.u32 %v4605_v38, 16  ;;  %v931_v52 = vshll.u32 %v4605_v38, 16  ;;  %v4606_v26 = vpack.c.bf16 %v888_v39, %v888_v39  ;;  %v4956_v53 = vadd.f32 %v849_v3, %v644_v47  ;;  %v4750_v54 = vpop.f32.mrb[6].mxu1 }
 0x113   : > { %v946_v55 = vrot.slane %v944_v44, 7  ;;  %v952_v57 = vshrl.u32 %v4608_v25, 16  ;;  %v955_v58 = vshll.u32 %v4608_v25, 16  ;;  %v885_v59 = vadd.f32 %v4955_v46, %v5418_v12  ;;  %v647_v60 = vpop.f32.mrb[7].mxu1  ;;  %v1050_v25 = vld [vmem:[#allocation2 + $0x38] sm:$0xf] }
 0x114   : > { %v930_v62 = vrot.slane %v928_v51, 7  ;;  %v936_v4 = vshrl.u32 %v4606_v26, 16  ;;  %v939_v19 = vshll.u32 %v4606_v26, 16  ;;  %v883_v5 = vadd.f32 %v4956_v53, %v5418_v12  ;;  %v1053_v51 = vld [vmem:[#allocation2 + $0x3c] sm:$0x1] }
 0x115   : > { %v949_v6 = vor.u32 %v947_v45, %v946_v55  ;;  %v950_v13 = vrot.slane %v946_v55, 4  ;;  %v954_v14 = vrot.slane %v952_v57, 7  ;;  %v893_v0 = vmax.f32 %v885_v59, 0.0  ;;  %v1038_v53 = vld [vmem:[#allocation2 + $0x28] sm:$0xf] }
 0x116   : > { %v933_v1 = vor.u32 %v931_v52, %v930_v62  ;;  %v934_v3 = vrot.slane %v930_v62, 4  ;;  %v938_v15 = vrot.slane %v936_v4, 7  ;;  %v891_v16 = vmax.f32 %v883_v5, 0.0 }
 0x117   : > { %v1027_v17 = vsel %vm5437_vm9, %v949_v6, %v1026_v48  ;;  %v1030_v18 = vsel %vm5444_vm10, %v950_v13, %v1029_v50  ;;  %v957_v20 = vor.u32 %v955_v58, %v954_v14  ;;  %v958_v23 = vrot.slane %v954_v14, 4 }
 0x118   : > { %1028 = vst [vmem:[#allocation2 + $0x18] sm:$0xf] %v1027_v17  ;;  %1031 = vst [vmem:[#allocation2 + $0x1c] sm:$0x1] %v1030_v18  ;;  %v1012_v28 = vsel %vm5437_vm9, %v933_v1, %v1011_v56  ;;  %v1018_v29 = vsel %vm5444_vm10, %v934_v3, %v1017_v63  ;;  %v941_v30 = vor.u32 %v939_v19, %v938_v15  ;;  %v942_v33 = vrot.slane %v938_v15, 4 }
 0x119   : > { %1013 = vst [vmem:[#allocation2 + $0x8] sm:$0xf] %v1012_v28  ;;  %1019 = vst [vmem:[#allocation2 + $0xc] sm:$0x1] %v1018_v29  ;;  %v1033_v34 = vsel %vm5437_vm9, %v957_v20, %v1032_v49  ;;  %v1036_v21 = vsel %vm5444_vm10, %v958_v23, %v1035_v11  ;;  %v4611_v22 = vpack.c.bf16 %v893_v0, %v893_v0  ;;  %v5472_v48 = vrot.slane %v1086_v42, 4 }
 0x11a   : > { %v4609_v35 = vpack.c.bf16 %v891_v16, %v891_v16  ;;  %1034 = vst [vmem:[#allocation2 + $0x20] sm:$0xf] %v1033_v34  ;;  %1037 = vst [vmem:[#allocation2 + $0x24] sm:$0x1] %v1036_v21  ;;  %v1021_v36 = vsel %vm5437_vm9, %v941_v30, %v1020_v24  ;;  %v1024_v38 = vsel %vm5444_vm10, %v942_v33, %v1023_v27  ;;  %v5476_v50 = vrot.slane %v1089_v43, 5 }
 0x11b   : > { %v4957_v39 = vadd.f32 %v5409_v7, %v4750_v54  ;;  %v4958_v41 = vadd.f32 %v5413_v10, %v647_v60  ;;  %1022 = vst [vmem:[#allocation2 + $0x10] sm:$0xf] %v1021_v36  ;;  %1025 = vst [vmem:[#allocation2 + $0x14] sm:$0x1] %v1024_v38  ;;  %v976_v44 = vshrl.u32 %v4611_v22, 16  ;;  %v979_v10 = vshll.u32 %v4611_v22, 16 }
 0x11c   : > { %v960_v45 = vshrl.u32 %v4609_v35, 16  ;;  %v963_v26 = vshll.u32 %v4609_v35, 16  ;;  %v1041_v54 = vld [vmem:[#allocation2 + $0x2c] sm:$0x1]  ;;  %v1092_v62 = vsel %vm5296_vm3, %v5472_v48, %v5476_v50  ;;  %v1056_v3 = vld [vmem:[#allocation2 + $0x40] sm:$0xf] }
 0x11d   : > { %v886_v46 = vadd.f32 %v4957_v39, %v5418_v12  ;;  %v884_v47 = vadd.f32 %v4958_v41, %v5418_v12  ;;  %v978_v7 = vrot.slane %v976_v44, 7  ;;  %v1059_v11 = vld [vmem:[#allocation2 + $0x44] sm:$0x1]  ;;  %v1044_v15 = vld [vmem:[#allocation2 + $0x30] sm:$0xf] }
 0x11e   : > { %v962_v52 = vrot.slane %v960_v45, 7  ;;  %v1047_v29 = vld [vmem:[#allocation2 + $0x34] sm:$0x1] }
 0x11f   : > { %v894_v55 = vmax.f32 %v886_v46, 0.0  ;;  %v892_v56 = vmax.f32 %v884_v47, 0.0  ;;  %v981_v57 = vor.u32 %v979_v10, %v978_v7  ;;  %v982_v12 = vrot.slane %v978_v7, 4  ;;  %v5478_v31 = vld [vmem:[#allocation2 + $0x18] sm:$0xf] }
 0x120   : > { %v965_v58 = vor.u32 %v963_v26, %v962_v52  ;;  %v966_v59 = vrot.slane %v962_v52, 4  ;;  %v5480_v60 = vld [vmem:[#allocation2 + $0x8] sm:$0xf]  ;;  %v5482_v43 = vld [vmem:[#allocation2 + $0xc] sm:$0x1]  ;;  %v1122_v63 = vshrl.u32 %v5478_v31, 16 }
 0x121   : > { %v4612_v32 = vpack.c.bf16 %v894_v55, %v894_v55  ;;  %v4610_v42 = vpack.c.bf16 %v892_v56, %v892_v56  ;;  %v1051_v4 = vsel %vm5437_vm9, %v981_v57, %v1050_v25  ;;  %v1054_v19 = vsel %vm5444_vm10, %v982_v12, %v1053_v51  ;;  %v5507_v21 = vld [vmem:[#allocation2 + $0x1c] sm:$0x1]  ;;  %v5510_v44 = vld [vmem:[#allocation2 + $0x20] sm:$0xf]  ;;  %v5520_v26 = vld [vmem:[#allocation2 + $0x24] sm:$0x1] }
 0x122   : > { %v1039_v5 = vsel %vm5437_vm9, %v965_v58, %v1038_v53  ;;  %v1042_v6 = vsel %vm5444_vm10, %v966_v59, %v1041_v54  ;;  %1052 = vst [vmem:[#allocation2 + $0x38] sm:$0xf] %v1051_v4  ;;  %1055 = vst [vmem:[#allocation2 + $0x3c] sm:$0x1] %v1054_v19  ;;  %v5497_v0 = vld [vmem:[#allocation2 + $0x10] sm:$0xf] }
 0x123   : > { %1040 = vst [vmem:[#allocation2 + $0x28] sm:$0xf] %v1039_v5  ;;  %1043 = vst [vmem:[#allocation2 + $0x2c] sm:$0x1] %v1042_v6  ;;  %v984_v13 = vshrl.u32 %v4612_v32, 16  ;;  %v987_v14 = vshll.u32 %v4612_v32, 16 }
 0x124   : > { %v968_v49 = vshrl.u32 %v4610_v42, 16  ;;  %v1125_v1 = vshll.u32 %v5478_v31, 16  ;;  %v1094_v16 = vshrl.u32 %v5480_v60, 16  ;;  %v1097_v17 = vshll.u32 %v5480_v60, 16  ;;  %v5503_v20 = vld [vmem:[#allocation2 + $0x14] sm:$0x1] }
 0x125   : > { %v1103_v18 = vshll.u32 %v5482_v43, 16  ;;  %v1108_v23 = vshrl.u32 %v5497_v0, 16  ;;  %v986_v24 = vrot.slane %v984_v13, 7  ;;  %v971_v28 = vshll.u32 %v4610_v42, 16 }
 0x126   : > { %v970_v27 = vrot.slane %v968_v49, 7  ;;  %v1111_v30 = vshll.u32 %v5497_v0, 16  ;;  %v1096_v33 = vrot.slane %v1094_v16, 4  ;;  %v1099_v34 = vrot.slane %v1097_v17, 5 }
 0x127   : > { %v1110_v22 = vrot.slane %v1108_v23, 4  ;;  %v1117_v35 = vshll.u32 %v5503_v20, 16  ;;  %v989_v36 = vor.u32 %v987_v14, %v986_v24  ;;  %v990_v38 = vrot.slane %v986_v24, 4 }
 0x128   : > { %v973_v39 = vor.u32 %v971_v28, %v970_v27  ;;  %v974_v41 = vrot.slane %v970_v27, 4  ;;  %v1100_v45 = vor.u32 %v1099_v34, %v1096_v33  ;;  %v1105_v25 = vrot.slane %v1103_v18, 5 }
 0x129   : > { %v1113_v46 = vrot.slane %v1111_v30, 5  ;;  %v1124_v47 = vrot.slane %v1122_v63, 4  ;;  %v1057_v7 = vsel %vm5437_vm9, %v989_v36, %v1056_v3  ;;  %v1060_v10 = vsel %vm5444_vm10, %v990_v38, %v1059_v11  ;;  %v5533_v6 = vld [vmem:[#allocation2 + $0x38] sm:$0xf]  ;;  %v5545_v23 = vld [vmem:[#allocation2 + $0x3c] sm:$0x1] }
 0x12a   : > { %v1045_v51 = vsel %vm5437_vm9, %v973_v39, %v1044_v15  ;;  %v1048_v52 = vsel %vm5444_vm10, %v974_v41, %v1047_v29  ;;  %1058 = vst [vmem:[#allocation2 + $0x40] sm:$0xf] %v1057_v7  ;;  %1061 = vst [vmem:[#allocation2 + $0x44] sm:$0x1] %v1060_v10  ;;  %v1101_v53 = vrot.slane %v1100_v45, 4  ;;  %v1127_v55 = vrot.slane %v1125_v1, 5 }
 0x12b   : > { %1046 = vst [vmem:[#allocation2 + $0x30] sm:$0xf] %v1045_v51  ;;  %1049 = vst [vmem:[#allocation2 + $0x34] sm:$0x1] %v1048_v52  ;;  %v1114_v54 = vor.u32 %v1113_v46, %v1110_v22  ;;  %v1131_v56 = vshll.u32 %v5507_v21, 16  ;;  %v1119_v12 = vrot.slane %v1117_v35, 5 }
 0x12c   : > { %v5523_v57 = vld [vmem:[#allocation2 + $0x28] sm:$0xf]  ;;  %v1136_v58 = vshrl.u32 %v5510_v44, 16  ;;  %v1139_v59 = vshll.u32 %v5510_v44, 16  ;;  %v1106_v42 = vsel %vm5296_vm3, %v1101_v53, %v1105_v25  ;;  %v1128_v4 = vor.u32 %v1127_v55, %v1124_v47  ;;  %v5530_v19 = vld [vmem:[#allocation2 + $0x2c] sm:$0x1] }
 0x12d   : > { %v1150_v32 = vshrl.u32 %v5523_v57, 16  ;;  %v1115_v63 = vrot.slane %v1114_v54, 4  ;;  %v1145_v5 = vshll.u32 %v5520_v26, 16  ;;  %v4385_v13 = vcombine.low %v1092_v62, %v1106_v42  ;;  %v4409_v38 = vld [vmem:[%s6214_s3 + $0x8] sm:$0xf] }
 0x12e   : > { %v1133_v14 = vrot.slane %v1131_v56, 5  ;;  %v1138_v49 = vrot.slane %v1136_v58, 4  ;;  %v1141_v1 = vrot.slane %v1139_v59, 5  ;;  %v1129_v11 = vrot.slane %v1128_v4, 4  ;;  %v1387_v4 = vld [vmem:[#allocation2] sm:$0xe] }
 0x12f   : > { %v1120_v3 = vsel %vm5296_vm3, %v1115_v63, %v1119_v12  ;;  %v1152_v15 = vrot.slane %v1150_v32, 4  ;;  %v1153_v16 = vshll.u32 %v5523_v57, 16  ;;  %4773 = vmatprep.mubr.msk.bf16.mxu1 %vm1205_vm11, %v4385_v13  ;;  %v1159_v18 = vshll.u32 %v5530_v19, 16 }
 0x130   : > { %v1142_v17 = vor.u32 %v1141_v1, %v1138_v49  ;;  %v1178_v48 = vshrl.u32 %v5533_v6, 16  ;;  %v1181_v50 = vshll.u32 %v5533_v6, 16  ;;  %v1134_v62 = vsel %vm5296_vm3, %v1129_v11, %v1133_v14 }
 0x131   : > { %v1155_v24 = vrot.slane %v1153_v16, 5  ;;  %v4386_v27 = vcombine.low %v1120_v3, %v1134_v62  ;;  %v1320_v28 = vsel %vm1218_vm6, %v5405_v9, 0  ;;  %v1147_v29 = vrot.slane %v1145_v5, 5  ;;  %v1388_v5 = vld [vmem:[#allocation2 + $0x8] sm:$0xe] }
 0x132   : > { %v1068_v30 = vld [vmem:[#allocation2 + $0x30] sm:$0xf]  ;;  %v5553_v33 = vld [vmem:[#allocation2 + $0x34] sm:$0x1]  ;;  %v1143_v34 = vrot.slane %v1142_v17, 4  ;;  %v1161_v39 = vrot.slane %v1159_v18, 5  ;;  %v4393_v63 = vcombine.low %v5411_v8, %v5480_v60  ;;  %v4394_v13 = vcombine.low %v5497_v0, %v5478_v31 }
 0x133   : > { %v1156_v22 = vor.u32 %v1155_v24, %v1152_v15  ;;  %v1164_v35 = vshrl.u32 %v1068_v30, 16  ;;  %v1167_v36 = vshll.u32 %v1068_v30, 16  ;;  %4774 = vmatmul.mubr.msk.bf16.vlgmr.msra.gmra.mrb[8].mxu1 %vm1205_vm11, %v4386_v27  ;;  %v1180_v41 = vrot.slane %v1178_v48, 4  ;;  %v4418_v8 = vld [vmem:[%s6214_s3 + $0xc] sm:$0xf] }
 0x134   : > { %v1183_v45 = vrot.slane %v1181_v50, 5  ;;  %v1187_v25 = vshll.u32 %v5545_v23, 16  ;;  %4782 = vmatpush3.bf16.msra.mxu1 %v1320_v28  ;;  %v1173_v7 = vshll.u32 %v5553_v33, 16  ;;  %v1148_v51 = vsel %vm5296_vm3, %v1143_v34, %v1147_v29  ;;  %v1391_v48 = vld [vmem:[#allocation2 + $0x20] sm:$0xe] }
 0x135   : > { %v1157_v9 = vrot.slane %v1156_v22, 4  ;;  %v1166_v46 = vrot.slane %v1164_v35, 4  ;;  %v1169_v47 = vrot.slane %v1167_v36, 5  ;;  %5105 = vmatprep.subr.msk.bf16.mxu1 %vm1218_vm6, %v4409_v38  ;;  %v1473_v14 = vsel %vm1218_vm6, %v4409_v38, 0 }
 0x136   : > { %v1184_v10 = vor.u32 %v1183_v45, %v1180_v41  ;;  %v1175_v12 = vrot.slane %v1173_v7, 5  ;;  %v1189_v58 = vrot.slane %v1187_v25, 5  ;;  %v4395_v49 = vcombine.low %v5510_v44, %v5523_v57  ;;  %v1389_v57 = vld [vmem:[#allocation2 + $0x10] sm:$0xe] }
 0x137   : > { %v1162_v52 = vsel %vm5296_vm3, %v1157_v9, %v1161_v39  ;;  %v1170_v53 = vor.u32 %v1169_v47, %v1166_v46  ;;  %v4401_v60 = vrot.slane %v1387_v4, 9  ;;  %v1416_v1 = vrot.slane %v5430_v37, 5  ;;  %v1392_v37 = vld [vmem:[#allocation2 + $0x28] sm:$0xe]  ;;  %v4427_v39 = vld [vmem:[%s6214_s3 + $0x10] sm:$0xf] }
 0x138   : > { %v4387_v54 = vcombine.low %v1148_v51, %v1162_v52  ;;  %v1185_v55 = vrot.slane %v1184_v10, 4  ;;  %v4402_v3 = vrot.slane %v1388_v5, 9  ;;  %v1420_v11 = vrot.slane %v5482_v43, 5  ;;  %v1390_v43 = vld [vmem:[#allocation2 + $0x18] sm:$0xe] }
 0x139   : > { %v1171_v56 = vrot.slane %v1170_v53, 4  ;;  %v1417_v0 = vsel %vm5587_vm14, %v4401_v60, %v1416_v1  ;;  %v4396_v15 = vcombine.low %v1068_v30, %v5533_v6  ;;  %v4403_v17 = vrot.slane %v1389_v57, 9  ;;  %v1393_v30 = vld [vmem:[#allocation2 + $0x30] sm:$0xe]  ;;  %v1666_v46 = vld [vmem:[#allocation2 + $0x8] sm:$0xf] }
 0x13a   : > { %4777 = vmatprep.mubr.msk.bf16.mxu1 %vm1205_vm11, %v4387_v54  ;;  %v1190_v32 = vsel %vm5296_vm3, %v1185_v55, %v1189_v58  ;;  %v1421_v44 = vsel %vm5587_vm14, %v4402_v3, %v1420_v11  ;;  %v1424_v18 = vrot.slane %v5503_v20, 5  ;;  %v4406_v50 = vrot.slane %v1392_v37, 9  ;;  %v1668_v25 = vld [vmem:[#allocation2 + $0x10] sm:$0xf]  ;;  %v1672_v55 = vld [vmem:[#allocation2 + $0x20] sm:$0xf] }
 0x13b   : > { %v1176_v59 = vsel %vm5296_vm3, %v1171_v56, %v1175_v12  ;;  %v4410_v16 = vcombine.low %v1417_v0, %v1421_v44  ;;  %v1436_v62 = vrot.slane %v5530_v19, 5  ;;  %v4404_v24 = vrot.slane %v1390_v43, 9  ;;  %v5147_v53 = vld [vmem:[#allocation2 + $0x8] ss:$8 sps:$4 sm:$0xff]   ;;  %v5148_v3 = vld [vmem:[#allocation2 + $0x18] ss:$8 sps:$4 sm:$0xff]  }
 0x13c   : > { %v4388_v42 = vcombine.low %v1176_v59, %v1190_v32  ;;  %v1428_v27 = vrot.slane %v5507_v21, 5  ;;  %v4405_v28 = vrot.slane %v1391_v48, 9  ;;  %v1432_v29 = vrot.slane %v5520_v26, 5  ;;  %v1394_v21 = vld [vmem:[#allocation2 + $0x38] sm:$0xe] }
 0x13d   : > { %v1425_v6 = vsel %vm5587_vm14, %v4403_v17, %v1424_v18  ;;  %v1437_v20 = vsel %vm5587_vm14, %v4406_v50, %v1436_v62  ;;  %v1591_v19 = vsel %vm1218_vm6, %v4418_v8, 0  ;;  %v4407_v38 = vrot.slane %v1393_v30, 9  ;;  %v1676_v56 = vld [vmem:[#allocation2 + $0x30] sm:$0xf]  ;;  %v1670_v59 = vld [vmem:[#allocation2 + $0x18] sm:$0xf] }
 0x13e   : > { %4778 = vmatmul.mubr.msk.bf16.gmra.mrb[12].mxu1 %vm1205_vm11, %v4388_v42  ;;  %v1429_v34 = vsel %vm5587_vm14, %v4404_v24, %v1428_v27  ;;  %v1433_v35 = vsel %vm5587_vm14, %v4405_v28, %v1432_v29  ;;  %v1440_v26 = vrot.slane %v5553_v33, 5  ;;  %v4408_v41 = vrot.slane %v1394_v21, 9  ;;  %v5626_v32 = vld [vmem:[#allocation2 + $0x14] sm:$0x1]  ;;  %v1674_v4 = vld [vmem:[#allocation2 + $0x28] sm:$0xf] }
 0x13f   : > { %4783 = vmatprep.mubr.msk.bf16.mxu1 %vm1205_vm11, %v4393_v63  ;;  %v4411_v22 = vcombine.low %v1425_v6, %v1429_v34  ;;  %v4412_v36 = vcombine.low %v1433_v35, %v1437_v20  ;;  %v1444_v45 = vrot.slane %v5545_v23, 5  ;;  %v1697_v33 = vshrl.u32 %v1668_v25, 16  ;;  %v5149_v37 = vld [vmem:[#allocation2 + $0x28] ss:$8 sps:$4 sm:$0xff]   ;;  %v1680_v62 = vld [vmem:[#allocation2 + $0x40] sm:$0xf] }
 0x140   : > { %v1441_v9 = vsel %vm5587_vm14, %v4407_v38, %v1440_v26  ;;  %v1700_v47 = vshll.u32 %v1668_v25, 16  ;;  %v1683_v51 = vshrl.u32 %v1666_v46, 16  ;;  %v1686_v52 = vshll.u32 %v1666_v46, 16  ;;  %v5640_v24 = vld [vmem:[#allocation2 + $0x24] sm:$0x1] }
 0x141   : > { %v1445_v7 = vsel %vm5587_vm14, %v4408_v41, %v1444_v45  ;;  %v1699_v54 = vrot.slane %v1697_v33, 4  ;;  %v1725_v42 = vshrl.u32 %v1672_v55, 16  ;;  %v1728_v63 = vshll.u32 %v1672_v55, 16  ;;  %v1678_v34 = vld [vmem:[#allocation2 + $0x38] sm:$0xf] }
 0x142   : > { %v4413_v10 = vcombine.low %v1441_v9, %v1445_v7  ;;  %v1702_v23 = vrot.slane %v1700_v47, 5  ;;  %v1685_v12 = vrot.slane %v1683_v51, 4  ;;  %v1688_v58 = vrot.slane %v1686_v52, 5  ;;  %v5646_v35 = vld [vmem:[#allocation2 + $0x34] sm:$0x1] }
 0x143   : > { %v1711_v60 = vshrl.u32 %v1670_v59, 16  ;;  %v1714_v1 = vshll.u32 %v1670_v59, 16  ;;  %v1706_v0 = vshll.u32 %v5626_v32, 16  ;;  %v1739_v44 = vshrl.u32 %v1674_v4, 16  ;;  %v5651_v25 = vld [vmem:[#allocation2 + $0x2c] sm:$0x1] }
 0x144   : > { %v1703_v5 = vor.u32 %v1702_v23, %v1699_v54  ;;  %v1689_v11 = vor.u32 %v1688_v58, %v1685_v12  ;;  %v1742_v57 = vshll.u32 %v1674_v4, 16  ;;  %v1727_v43 = vrot.slane %v1725_v42, 4  ;;  %v5150_v33 = vld [vmem:[#allocation2 + $0x38] ss:$8 sps:$4 sm:$0xff]  }
 0x145   : > { %v1713_v27 = vrot.slane %v1711_v60, 4  ;;  %v1716_v28 = vrot.slane %v1714_v1, 5  ;;  %v1708_v6 = vrot.slane %v1706_v0, 5  ;;  %v1741_v20 = vrot.slane %v1739_v44, 4 }
 0x146   : > { %4784 = vmatmul.mubr.msk.bf16.vlgmr.msra.gmra.mrb[8].mxu1 %vm1205_vm11, %v4394_v13  ;;  %v1753_v13 = vshrl.u32 %v1676_v56, 16  ;;  %v1704_v18 = vrot.slane %v1703_v5, 4  ;;  %v1690_v29 = vrot.slane %v1689_v11, 4  ;;  %v1744_v30 = vrot.slane %v1742_v57, 5  ;;  %v5660_v5 = vld [vmem:[#allocation2 + $0x44] sm:$0x1] }
 0x147   : > { %4792 = vmatpush3.bf16.msra.mxu1 %v1473_v14  ;;  %4787 = vmatprep.mubr.msk.bf16.mxu1 %vm1205_vm11, %v4395_v49  ;;  %v1756_v14 = vshll.u32 %v1676_v56, 16  ;;  %v1821_v49 = vsel %vm1218_vm6, %v4427_v39, 0  ;;  %v1781_v21 = vshrl.u32 %v1680_v62, 16  ;;  %v1717_v41 = vor.u32 %v1716_v28, %v1713_v27  ;;  %v1897_v57 = vld [vmem:[#allocation2 + $0x10] sm:$0xe] }
 0x148   : > { %5106 = vmatprep.subr.msk.bf16.mxu1 %vm1218_vm6, %v4418_v8  ;;  %v5629_v8 = vld [vmem:[#allocation2 + $0xc] sm:$0x1]  ;;  %v1755_v48 = vrot.slane %v1753_v13, 4  ;;  %v1709_v26 = vsel %vm5296_vm3, %v1704_v18, %v1708_v6  ;;  %v1734_v45 = vshll.u32 %v5640_v24, 16  ;;  %v1767_v9 = vshrl.u32 %v1678_v34, 16 }
 0x149   : > { %v1692_v17 = vshll.u32 %v5629_v8, 16  ;;  %v1758_v50 = vrot.slane %v1756_v14, 5  ;;  %v1770_v46 = vshll.u32 %v1678_v34, 16  ;;  %v1762_v51 = vshll.u32 %v5646_v35, 16 }
 0x14a   : > { %v1783_v54 = vrot.slane %v1781_v21, 4  ;;  %v1748_v55 = vshll.u32 %v5651_v25, 16  ;;  %v1718_v12 = vrot.slane %v1717_v41, 4  ;;  %v1736_v58 = vrot.slane %v1734_v45, 5  ;;  %v1899_v21 = vld [vmem:[#allocation2 + $0x20] sm:$0xe] }
 0x14b   : > { %v1694_v38 = vrot.slane %v1692_v17, 5  ;;  %v1769_v59 = vrot.slane %v1767_v9, 4  ;;  %v1772_v42 = vrot.slane %v1770_v46, 5  ;;  %v1764_v4 = vrot.slane %v1762_v51, 5  ;;  %v1900_v9 = vld [vmem:[#allocation2 + $0x28] sm:$0xe] }
 0x14c   : > { %v1750_v60 = vrot.slane %v1748_v55, 5  ;;  %v1790_v44 = vshll.u32 %v5660_v5, 16  ;;  %v4437_v27 = vrot.slane %v1897_v57, 9  ;;  %v1926_v28 = vrot.slane %v5626_v32, 5  ;;  %v2179_v57 = vld [vmem:[#allocation2 + $0x28] sm:$0xf] }
 0x14d   : > { %v1695_v47 = vsel %vm5296_vm3, %v1690_v29, %v1694_v38  ;;  %v1773_v0 = vor.u32 %v1772_v42, %v1769_v59  ;;  %v4439_v41 = vrot.slane %v1899_v21, 9  ;;  %v1934_v45 = vrot.slane %v5640_v24, 5 }
 0x14e   : > { %4788 = vmatmul.mubr.msk.bf16.gmra.mrb[12].mxu1 %vm1205_vm11, %v4396_v15  ;;  %v5635_v15 = vld [vmem:[%s6214_s3 + $0x14] sm:$0xf]  ;;  %v4428_v52 = vcombine.low %v1695_v47, %v1709_v26  ;;  %v1792_v29 = vrot.slane %v1790_v44, 5  ;;  %v1938_v51 = vrot.slane %v5651_v25, 5  ;;  %v1950_v25 = vrot.slane %v5660_v5, 5 }
 0x14f   : > { %4793 = vmatprep.mubr.msk.bf16.mxu1 %vm1205_vm11, %v4410_v16  ;;  %v1730_v16 = vrot.slane %v1728_v63, 5 }
 0x156   : > { %4794 = vmatmul.mubr.msk.bf16.vlgmr.msra.gmra.mrb[8].mxu1 %vm1205_vm11, %v4411_v22  ;;  %v5644_v22 = vld [vmem:[#allocation2 + $0x1c] sm:$0x1] }
 0x157   : > { %4802 = vmatpush3.bf16.msra.mxu1 %v1591_v19  ;;  %4797 = vmatprep.mubr.msk.bf16.mxu1 %vm1205_vm11, %v4412_v36  ;;  %v1731_v19 = vor.u32 %v1730_v16, %v1727_v43  ;;  %v1784_v36 = vshll.u32 %v1680_v62, 16  ;;  %v1720_v7 = vshll.u32 %v5644_v22, 16  ;;  %v1979_v43 = vsel %vm1218_vm6, %v5635_v15, 0  ;;  %v4453_v62 = vld [vmem:[%s6214_s3 + $0x18] sm:$0xf] }
 0x158   : > { %5107 = vmatprep.subr.msk.bf16.mxu1 %vm1218_vm6, %v4427_v39  ;;  %v1759_v39 = vor.u32 %v1758_v50, %v1755_v48  ;;  %v1896_v50 = vld [vmem:[#allocation2 + $0x8] sm:$0xe] }
 0x159   : > { %v1786_v23 = vrot.slane %v1784_v36, 5  ;;  %v1722_v13 = vrot.slane %v1720_v7, 5  ;;  %v4436_v6 = vrot.slane %v1896_v50, 9  ;;  %v1901_v36 = vld [vmem:[#allocation2 + $0x30] sm:$0xe]  ;;  %v1930_v7 = vrot.slane %v5644_v22, 5 }
 0x15a   : > { %v1760_v56 = vrot.slane %v1759_v39, 4  ;;  %v1898_v39 = vld [vmem:[#allocation2 + $0x18] sm:$0xe]  ;;  %v4441_v46 = vrot.slane %v1901_v36, 9  ;;  %v2235_v50 = vshll.u32 %v2179_v57, 16 }
 0x15b   : > { %v1723_v11 = vsel %vm5296_vm3, %v1718_v12, %v1722_v13  ;;  %v4438_v47 = vrot.slane %v1898_v39, 9  ;;  %v1902_v22 = vld [vmem:[#allocation2 + $0x38] sm:$0xe]  ;;  %v5730_v39 = vld [vmem:[%s6214_s3 + $0x20] sm:$0xf] }
 0x15c   : > { %v1765_v1 = vsel %vm5296_vm3, %v1760_v56, %v1764_v4  ;;  %v4442_v59 = vrot.slane %v1902_v22, 9  ;;  %v2175_v13 = vld [vmem:[#allocation2 + $0x18] sm:$0xf] }
 0x15e   : > { %4798 = vmatmul.mubr.msk.bf16.gmra.mrb[12].mxu1 %vm1205_vm11, %v4413_v10  ;;  %v1745_v10 = vor.u32 %v1744_v30, %v1741_v20  ;;  %v1922_v20 = vrot.slane %v5629_v8, 5 }
 0x15f   : > { %4803 = vmatprep.mubr.msk.bf16.mxu1 %vm1205_vm11, %v5147_v53  ;;  %v1732_v53 = vrot.slane %v1731_v19, 4  ;;  %v1927_v19 = vsel %vm5587_vm14, %v4437_v27, %v1926_v28 }
 0x160   : > { %v1746_v63 = vrot.slane %v1745_v10, 4  ;;  %v1923_v26 = vsel %vm5587_vm14, %v4436_v6, %v1922_v20  ;;  %v4440_v10 = vrot.slane %v1900_v9, 9  ;;  %v5724_v20 = vld [vmem:[#allocation2 + $0x1c] sm:$0x1] }
 0x161   : > { %v1737_v14 = vsel %vm5296_vm3, %v1732_v53, %v1736_v58  ;;  %v4445_v8 = vcombine.low %v1923_v26, %v1927_v19  ;;  %v1903_v53 = vld [vmem:[#allocation2 + $0x40] sm:$0xe]  ;;  %v4462_v58 = vld [vmem:[%s6214_s3 + $0x1c] sm:$0xf]  ;;  %v5153_v26 = vld [vmem:[#allocation2 + $0x30] ss:$8 sps:$4 sm:$0xff]  }
 0x162   : > { %v1751_v16 = vsel %vm5296_vm3, %v1746_v63, %v1750_v60  ;;  %v1939_v55 = vsel %vm5587_vm14, %v4440_v10, %v1938_v51  ;;  %v4443_v12 = vrot.slane %v1903_v53, 9  ;;  %v2173_v63 = vld [vmem:[#allocation2 + $0x10] sm:$0xf]  ;;  %v2328_v6 = vsel %vm1218_vm6, %v4462_v58, 0  ;;  %v5152_v19 = vld [vmem:[#allocation2 + $0x20] ss:$8 sps:$4 sm:$0xff]  }
 0x163   : > { %v4430_v17 = vcombine.low %v1751_v16, %v1765_v1  ;;  %v2190_v5 = vshrl.u32 %v2173_v63, 16  ;;  %v2204_v1 = vshrl.u32 %v2175_v13, 16  ;;  %v2213_v9 = vshll.u32 %v5724_v20, 16 }
 0x164   : > { %v1951_v4 = vsel %vm5587_vm14, %v4443_v12, %v1950_v25 }
 0x165   : > { %v2192_v44 = vrot.slane %v2190_v5, 4 }
 0x166   : > { %4804 = vmatmul.mubr.msk.bf16.vlgmr.msra.gmra.mrb[8].mxu1 %vm1205_vm11, %v5148_v3  ;;  %v5666_v3 = vld [vmem:[#allocation2 + $0x3c] sm:$0x1] }
 0x167   : > { %4812 = vmatpush3.bf16.msra.mxu1 %v1821_v49  ;;  %4807 = vmatprep.mubr.msk.bf16.mxu1 %vm1205_vm11, %v5149_v37  ;;  %v1787_v49 = vor.u32 %v1786_v23, %v1783_v54  ;;  %v4429_v37 = vcombine.low %v1723_v11, %v1737_v14  ;;  %v1776_v18 = vshll.u32 %v5666_v3, 16  ;;  %v1931_v54 = vsel %vm5587_vm14, %v4438_v47, %v1930_v7  ;;  %v2185_v47 = vld [vmem:[#allocation2 + $0x40] sm:$0xf] }
 0x168   : > { %5108 = vmatprep.subr.msk.bf16.mxu1 %vm1218_vm6, %v5635_v15  ;;  %v1774_v15 = vrot.slane %v1773_v0, 4  ;;  %v1946_v42 = vrot.slane %v5666_v3, 5  ;;  %v2193_v14 = vshll.u32 %v2173_v63, 16  ;;  %v2207_v11 = vshll.u32 %v2175_v13, 16  ;;  %v5151_v0 = vld [vmem:[#allocation2 + $0x10] ss:$8 sps:$4 sm:$0xff]  }
 0x169   : > { %v1788_v48 = vrot.slane %v1787_v49, 4  ;;  %v1778_v30 = vrot.slane %v1776_v18, 5  ;;  %v5721_v18 = vld [vmem:[#allocation2 + $0x14] sm:$0x1]  ;;  %v2274_v12 = vshrl.u32 %v2185_v47, 16  ;;  %v2277_v25 = vshll.u32 %v2185_v47, 16 }
 0x16a   : > { %v1947_v49 = vsel %vm5587_vm14, %v4442_v59, %v1946_v42  ;;  %v2195_v3 = vrot.slane %v2193_v14, 5  ;;  %v2209_v16 = vrot.slane %v2207_v11, 5  ;;  %v2199_v21 = vshll.u32 %v5721_v18, 16  ;;  %v5746_v13 = vld [vmem:[#allocation2 + $0x3c] sm:$0x1] }
 0x16b   : > { %v1793_v34 = vsel %vm5296_vm3, %v1788_v48, %v1792_v29  ;;  %v1779_v32 = vsel %vm5296_vm3, %v1774_v15, %v1778_v30  ;;  %v4448_v60 = vcombine.low %v1947_v49, %v1951_v4  ;;  %v2232_v48 = vshrl.u32 %v2179_v57, 16  ;;  %v2187_v29 = vld [vmem:[#allocation2 + $0x48] sm:$0xf]  ;;  %v2404_v47 = vld [vmem:[#allocation2 + $0x18] sm:$0xe] }
 0x16c   : > { %v4431_v38 = vcombine.low %v1779_v32, %v1793_v34  ;;  %v2196_v27 = vor.u32 %v2195_v3, %v2192_v44  ;;  %v2288_v51 = vshrl.u32 %v2187_v29, 16  ;;  %v2215_v59 = vrot.slane %v2213_v9, 5  ;;  %v5154_v49 = vld [vmem:[#allocation2 + $0x40] ss:$8 sps:$4 sm:$0xff]  }
 0x16d   : > { %v2276_v57 = vrot.slane %v2274_v12, 4 }
 0x16e   : > { %4808 = vmatmul.mubr.msk.bf16.gmra.mrb[12].mxu1 %vm1205_vm11, %v5150_v33  ;;  %v1942_v33 = vrot.slane %v5646_v35, 5  ;;  %v2098_v35 = vsel %vm1218_vm6, %v4453_v62, 0  ;;  %v2290_v5 = vrot.slane %v2288_v51, 4 }
 0x16f   : > { %4813 = vmatprep.mubr.msk.bf16.mxu1 %vm1205_vm11, %v4428_v52  ;;  %v1935_v52 = vsel %vm5587_vm14, %v4439_v41, %v1934_v45  ;;  %v2237_v41 = vrot.slane %v2235_v50, 5  ;;  %v2197_v45 = vrot.slane %v2196_v27, 4  ;;  %v5755_v27 = vld [vmem:[#allocation2 + $0x44] sm:$0x1] }
 0x170   : > { %v1943_v24 = vsel %vm5587_vm14, %v4441_v46, %v1942_v33  ;;  %v4446_v23 = vcombine.low %v1931_v54, %v1935_v52  ;;  %v2291_v52 = vshll.u32 %v2187_v29, 16  ;;  %v5737_v54 = vld [vmem:[#allocation2 + $0x2c] sm:$0x1] }
 0x171   : > { %v4447_v56 = vcombine.low %v1939_v55, %v1943_v24  ;;  %v2201_v24 = vrot.slane %v2199_v21, 5  ;;  %v5739_v55 = vld [vmem:[#allocation2 + $0x24] sm:$0x1]  ;;  %v2241_v4 = vshll.u32 %v5737_v54, 16 }
 0x172   : > { %v2293_v14 = vrot.slane %v2291_v52, 5  ;;  %v4472_v52 = vrot.slane %v2404_v47, 9 }
 0x176   : > { %4814 = vmatmul.mubr.msk.bf16.vlgmr.msra.gmra.mrb[8].mxu1 %vm1205_vm11, %v4429_v37  ;;  %v2181_v37 = vld [vmem:[#allocation2 + $0x30] sm:$0xf] }
 0x177   : > { %4822 = vmatpush3.bf16.msra.mxu1 %v1979_v43  ;;  %4817 = vmatprep.mubr.msk.bf16.mxu1 %vm1205_vm11, %v4430_v17  ;;  %v2206_v43 = vrot.slane %v2204_v1, 4  ;;  %v2177_v17 = vld [vmem:[#allocation2 + $0x20] sm:$0xf]  ;;  %v2246_v28 = vshrl.u32 %v2181_v37, 16  ;;  %v2249_v15 = vshll.u32 %v2181_v37, 16  ;;  %v2227_v1 = vshll.u32 %v5739_v55, 16 }
 0x178   : > { %5109 = vmatprep.subr.msk.bf16.mxu1 %vm1218_vm6, %v4453_v62  ;;  %v2183_v62 = vld [vmem:[#allocation2 + $0x38] sm:$0xf]  ;;  %v2218_v30 = vshrl.u32 %v2177_v17, 16  ;;  %v2221_v34 = vshll.u32 %v2177_v17, 16  ;;  %v2279_v37 = vrot.slane %v2277_v25, 5 }
 0x179   : > { %v2210_v32 = vor.u32 %v2209_v16, %v2206_v43  ;;  %v2260_v36 = vshrl.u32 %v2183_v62, 16  ;;  %v2248_v46 = vrot.slane %v2246_v28, 4  ;;  %v2251_v33 = vrot.slane %v2249_v15, 5  ;;  %v5757_v28 = vld [vmem:[#allocation2 + $0x4c] sm:$0x1] }
 0x17a   : > { %v2220_v7 = vrot.slane %v2218_v30, 4  ;;  %v2223_v10 = vrot.slane %v2221_v34, 5  ;;  %v2269_v16 = vshll.u32 %v5746_v13, 16  ;;  %v2294_v15 = vor.u32 %v2293_v14, %v2290_v5  ;;  %v2405_v25 = vld [vmem:[#allocation2 + $0x20] sm:$0xe] }
 0x17b   : > { %v2211_v53 = vrot.slane %v2210_v32, 4  ;;  %v2252_v42 = vor.u32 %v2251_v33, %v2248_v46  ;;  %v2229_v29 = vrot.slane %v2227_v1, 5  ;;  %v2280_v30 = vor.u32 %v2279_v37, %v2276_v57 }
 0x17c   : > { %v2224_v63 = vor.u32 %v2223_v10, %v2220_v7  ;;  %v2297_v34 = vshll.u32 %v5757_v28, 16  ;;  %v2271_v21 = vrot.slane %v2269_v16, 5  ;;  %v2295_v46 = vrot.slane %v2294_v15, 4  ;;  %v5823_v15 = vld [vmem:[%s6215_s4] ss:$0 sm:$0xff] }
 0x17d   : > { %v2253_v43 = vrot.slane %v2252_v42, 4  ;;  %v2281_v9 = vrot.slane %v2280_v30, 4  ;;  %v2429_v10 = vrot.slane %v5721_v18, 5  ;;  %v2408_v42 = vld [vmem:[#allocation2 + $0x38] sm:$0xe]  ;;  %v4473_v5 = vrot.slane %v2405_v25, 9 }
 0x17e   : > { %4818 = vmatmul.mubr.msk.bf16.gmra.mrb[12].mxu1 %vm1205_vm11, %v4431_v38  ;;  %v2263_v38 = vshll.u32 %v2183_v62, 16  ;;  %v2225_v17 = vrot.slane %v2224_v63, 4  ;;  %v2299_v33 = vrot.slane %v2297_v34, 5  ;;  %v2437_v14 = vrot.slane %v5739_v55, 5 }
 0x17f   : > { %4823 = vmatprep.mubr.msk.bf16.mxu1 %vm1205_vm11, %v4445_v8  ;;  %v2234_v8 = vrot.slane %v2232_v48, 4  ;;  %v2243_v48 = vrot.slane %v2241_v4, 5 }
 0x180   : > { %v2230_v32 = vsel %vm5296_vm3, %v2225_v17, %v2229_v29 }
 0x181   : > { %v2238_v22 = vor.u32 %v2237_v41, %v2234_v8  ;;  %v2486_v8 = vsel %vm1218_vm6, %v5730_v39, 0 }
 0x183   : > { %v2239_v3 = vrot.slane %v2238_v22, 4  ;;  %v2407_v22 = vld [vmem:[#allocation2 + $0x30] sm:$0xe] }
 0x184   : > { %v4475_v63 = vrot.slane %v2407_v22, 9 }
 0x186   : > { %4824 = vmatmul.mubr.msk.bf16.vlgmr.msra.gmra.mrb[8].mxu1 %vm1205_vm11, %v4446_v23  ;;  %v2262_v23 = vrot.slane %v2260_v36, 4  ;;  %v2283_v36 = vshll.u32 %v5755_v27, 16 }
 0x187   : > { %4832 = vmatpush3.bf16.msra.mxu1 %v2098_v35  ;;  %4827 = vmatprep.mubr.msk.bf16.mxu1 %vm1205_vm11, %v4447_v56  ;;  %v2265_v35 = vrot.slane %v2263_v38, 5  ;;  %v5741_v56 = vld [vmem:[#allocation2 + $0x34] sm:$0x1]  ;;  %v2403_v38 = vld [vmem:[#allocation2 + $0x10] sm:$0xe] }
 0x188   : > { %5110 = vmatprep.subr.msk.bf16.mxu1 %vm1218_vm6, %v4462_v58  ;;  %v2202_v58 = vsel %vm5296_vm3, %v2197_v45, %v2201_v24  ;;  %v2255_v11 = vshll.u32 %v5741_v56, 16  ;;  %v4471_v7 = vrot.slane %v2403_v38, 9  ;;  %v2285_v51 = vrot.slane %v2283_v36, 5 }
 0x189   : > { %v2445_v4 = vrot.slane %v5741_v56, 5 }
 0x18a   : > { %v2257_v50 = vrot.slane %v2255_v11, 5  ;;  %v2286_v24 = vsel %vm5296_vm3, %v2281_v9, %v2285_v51  ;;  %v2410_v11 = vld [vmem:[#allocation2 + $0x48] sm:$0xe] }
 0x18b   : > { %v4478_v57 = vrot.slane %v2410_v11, 9 }
 0x18e   : > { %4828 = vmatmul.mubr.msk.bf16.gmra.mrb[12].mxu1 %vm1205_vm11, %v4448_v60  ;;  %v2216_v60 = vsel %vm5296_vm3, %v2211_v53, %v2215_v59  ;;  %v2300_v53 = vsel %vm5296_vm3, %v2295_v46, %v2299_v33 }
 0x18f   : > { %4833 = vmatprep.mubr.msk.bf16.mxu1 %vm1205_vm11, %v5151_v0  ;;  %v2266_v0 = vor.u32 %v2265_v35, %v2262_v23  ;;  %v4463_v44 = vcombine.low %v2202_v58, %v2216_v60  ;;  %v2430_v23 = vsel %vm5587_vm14, %v4471_v7, %v2429_v10  ;;  %v2406_v35 = vld [vmem:[#allocation2 + $0x28] sm:$0xe]  ;;  %v4466_v12 = vcombine.low %v2286_v24, %v2300_v53  ;;  %v5835_v10 = vld [vmem:[#allocation3 + $0x4] sm:$0x1] }
 0x190   : > { %v4474_v59 = vrot.slane %v2406_v35, 9  ;;  %v2449_v60 = vrot.slane %v5746_v13, 5  ;;  %v2453_v13 = vrot.slane %v5755_v27, 5  ;;  %v5814_v27 = vld [vmem:[%s6216_s5] sm:$0xf]  ;;  %v2772_v24 = vshll.u32 %v5835_v10, 16 }
 0x191   : > { %v2267_v62 = vrot.slane %v2266_v0, 4  ;;  %v2409_v0 = vld [vmem:[#allocation2 + $0x40] sm:$0xe]  ;;  %v2712_v35 = vld [vmem:[#allocation3 + $0x1c] sm:$0x1] }
 0x192   : > { %v4477_v37 = vrot.slane %v2409_v0, 9 }
 0x193   : > { %v2272_v41 = vsel %vm5296_vm3, %v2267_v62, %v2271_v21 }
 0x194   : > { %v2454_v16 = vsel %vm5587_vm14, %v4477_v37, %v2453_v13  ;;  %v2718_v13 = vld [vmem:[#allocation3 + $0x24] sm:$0x1] }
 0x196   : > { %4834 = vmatmul.mubr.msk.bf16.vlgmr.msra.gmra.mrb[8].mxu1 %vm1205_vm11, %v5152_v19  ;;  %v2258_v19 = vsel %vm5296_vm3, %v2253_v43, %v2257_v50  ;;  %v2457_v43 = vrot.slane %v5757_v28, 5  ;;  %v4497_v50 = vld [vmem:[%s6216_s5 + $0x4] sm:$0xf]  ;;  %v5818_v28 = vld [vmem:[#allocation3] sm:$0xf] }
 0x197   : > { %4842 = vmatpush3.bf16.msra.mxu1 %v2328_v6  ;;  %4837 = vmatprep.mubr.msk.bf16.mxu1 %vm1205_vm11, %v5153_v26  ;;  %v2244_v6 = vsel %vm5296_vm3, %v2239_v3, %v2243_v48  ;;  %v4465_v45 = vcombine.low %v2258_v19, %v2272_v41  ;;  %v2901_v62 = vsel %vm1218_vm6, %v4497_v50, 0  ;;  %v2763_v29 = vshrl.u32 %v5818_v28, 16 }
 0x198   : > { %5111 = vmatprep.subr.msk.bf16.mxu1 %vm1218_vm6, %v5730_v39  ;;  %v4464_v26 = vcombine.low %v2230_v32, %v2244_v6  ;;  %v2433_v39 = vrot.slane %v5724_v20, 5  ;;  %v2441_v20 = vrot.slane %v5737_v54, 5  ;;  %v2446_v54 = vsel %vm5587_vm14, %v4475_v63, %v2445_v4  ;;  %5112 = vmatprep.subr.msk.bf16.mxu0 %vm1218_vm6, %v4497_v50 }
 0x199   : > { %v2458_v17 = vsel %vm5587_vm14, %v4478_v57, %v2457_v43  ;;  %4862 = vmatpush3.bf16.msra.mxu0 %v2901_v62  ;;  %v2766_v6 = vshll.u32 %v5818_v28, 16 }
 0x19a   : > { %v2434_v18 = vsel %vm5587_vm14, %v4472_v52, %v2433_v39  ;;  %v2442_v1 = vsel %vm5587_vm14, %v4474_v59, %v2441_v20  ;;  %v4483_v48 = vcombine.low %v2454_v16, %v2458_v17  ;;  %5113 = vmatprep.subr.msk.bf16.mxu0 %vm1218_vm6, %v5814_v27  ;;  %v2697_v59 = vld [vmem:[#allocation3 + $0x8] sm:$0xf] }
 0x19b   : > { %v4480_v58 = vcombine.low %v2430_v23, %v2434_v18  ;;  %v5832_v41 = vrot.slane %v2766_v6, 5  ;;  %v2709_v23 = vld [vmem:[#allocation3 + $0x18] sm:$0xf]  ;;  %v2706_v6 = vld [vmem:[#allocation3 + $0x14] sm:$0x1] }
 0x19e   : > { %4838 = vmatmul.mubr.msk.bf16.gmra.mrb[12].mxu1 %vm1205_vm11, %v5154_v49  ;;  %v4476_v49 = vrot.slane %v2408_v42, 9 }
 0x19f   : > { %4843 = vmatprep.mubr.msk.bf16.mxu1 %vm1205_vm11, %v4463_v44  ;;  %v2438_v44 = vsel %vm5587_vm14, %v4473_v5, %v2437_v14  ;;  %v2700_v14 = vld [vmem:[#allocation3 + $0xc] sm:$0x1] }
 0x1a0   : > { %v4481_v56 = vcombine.low %v2438_v44, %v2442_v1  ;;  %v2450_v3 = vsel %vm5587_vm14, %v4476_v49, %v2449_v60 }
 0x1a1   : > { %v4482_v55 = vcombine.low %v2446_v54, %v2450_v3 }
 0x1a6   : > { %4844 = vmatmul.mubr.msk.bf16.vlgmr.msra.gmra.mrb[8].mxu1 %vm1205_vm11, %v4464_v26 }
 0x1a7   : > { %4852 = vmatpush3.bf16.msra.mxu1 %v2486_v8  ;;  %4847 = vmatprep.mubr.msk.bf16.mxu1 %vm1205_vm11, %v4465_v45  ;;  %v5830_v8 = vrot.slane %v2763_v29, 4  ;;  %v2703_v29 = vld [vmem:[#allocation3 + $0x10] sm:$0xf] }
 0x1a9   : > { %v2769_v39 = vor.u32 %v5832_v41, %v5830_v8 }
 0x1ae   : > { %4848 = vmatmul.mubr.msk.bf16.gmra.mrb[12].mxu1 %vm1205_vm11, %v4466_v12 }
 0x1af   : > { %4853 = vmatprep.mubr.msk.bf16.mxu1 %vm1205_vm11, %v4480_v58 }
 0x1b6   : > { %4854 = vmatmul.mubr.msk.bf16.vlgmr.msra.gmra.mrb[8].mxu1 %vm1205_vm11, %v4481_v56  ;;  %v2715_v56 = vld [vmem:[#allocation3 + $0x20] sm:$0xf] }
 0x1b7   : > { %4857 = vmatprep.mubr.msk.bf16.mxu1 %vm1205_vm11, %v4482_v55 }
 0x1be   : > { %4858 = vmatmul.mubr.msk.bf16.gmra.mrb[12].mxu1 %vm1205_vm11, %v4483_v48 }
 0x289   : > { %v4855_v30 = vpop.f32.mrb[8].mxu1 }
 0x28a   : > { %v2570_v34 = vadd.f32 %v4855_v30, %v5823_v15  ;;  %v2522_v19 = vpop.f32.mrb[9].mxu1 }
 0x28b   : > { %v2568_v21 = vadd.f32 %v5823_v15, %v2522_v19  ;;  %v4856_v32 = vpop.f32.mrb[10].mxu1 }
 0x28c   : > { %v2578_v36 = vmax.f32 %v2570_v34, 0.0  ;;  %v2571_v38 = vadd.f32 %v4856_v32, %v5823_v15  ;;  %v2525_v26 = vpop.f32.mrb[11].mxu1 }
 0x28d   : > { %v2576_v45 = vmax.f32 %v2568_v21, 0.0  ;;  %v2569_v9 = vadd.f32 %v5823_v15, %v2525_v26 }
 0x28e   : > { %v4615_v46 = vpack.c.bf16 %v2578_v36, %v2578_v36  ;;  %v2579_v33 = vmax.f32 %v2571_v38, 0.0 }
 0x28f   : > { %v4613_v47 = vpack.c.bf16 %v2576_v45, %v2576_v45  ;;  %v2577_v7 = vmax.f32 %v2569_v9, 0.0 }
 0x290   : > { %v2633_v51 = vshrl.u32 %v4615_v46, 16  ;;  %v4616_v52 = vpack.c.bf16 %v2579_v33, %v2579_v33  ;;  %v2636_v53 = vshll.u32 %v4615_v46, 16 }
 0x291   : > { %v2617_v22 = vshrl.u32 %v4613_v47, 16  ;;  %v2620_v12 = vshll.u32 %v4613_v47, 16  ;;  %v4614_v18 = vpack.c.bf16 %v2577_v7, %v2577_v7  ;;  %v4859_v25 = vpop.f32.mrb[12].mxu1 }
 0x292   : > { %v2635_v58 = vrot.slane %v2633_v51, 7  ;;  %v2641_v20 = vshrl.u32 %v4616_v52, 16  ;;  %v2644_v42 = vshll.u32 %v4616_v52, 16  ;;  %v2574_v63 = vadd.f32 %v4859_v25, %v5823_v15  ;;  %v2538_v4 = vpop.f32.mrb[13].mxu1  ;;  %v2733_v51 = vld [vmem:[#allocation3 + $0x38] sm:$0xf] }
 0x293   : > { %v2619_v5 = vrot.slane %v2617_v22, 7  ;;  %v2625_v49 = vshrl.u32 %v4614_v18, 16  ;;  %v2628_v60 = vshll.u32 %v4614_v18, 16  ;;  %v2572_v1 = vadd.f32 %v5823_v15, %v2538_v4  ;;  %v4860_v11 = vpop.f32.mrb[14].mxu1  ;;  %v2736_v22 = vld [vmem:[#allocation3 + $0x3c] sm:$0x1] }
 0x294   : > { %v2638_v54 = vor.u32 %v2636_v53, %v2635_v58  ;;  %v2639_v0 = vrot.slane %v2635_v58, 4  ;;  %v2643_v44 = vrot.slane %v2641_v20, 7  ;;  %v2582_v3 = vmax.f32 %v2574_v63, 0.0  ;;  %v2541_v57 = vpop.f32.mrb[15].mxu1  ;;  %v2721_v25 = vld [vmem:[#allocation3 + $0x28] sm:$0xf] }
 0x295   : > { %v2622_v55 = vor.u32 %v2620_v12, %v2619_v5  ;;  %v2623_v37 = vrot.slane %v2619_v5, 4  ;;  %v2627_v43 = vrot.slane %v2625_v49, 7  ;;  %v2580_v16 = vmax.f32 %v2572_v1, 0.0  ;;  %v2724_v58 = vld [vmem:[#allocation3 + $0x2c] sm:$0x1] }
 0x296   : > { %v2710_v17 = vsel %vm5437_vm9, %v2638_v54, %v2709_v23  ;;  %v2713_v48 = vsel %vm5444_vm10, %v2639_v0, %v2712_v35  ;;  %v2646_v50 = vor.u32 %v2644_v42, %v2643_v44  ;;  %v2647_v62 = vrot.slane %v2643_v44, 4  ;;  %v2739_v44 = vld [vmem:[#allocation3 + $0x40] sm:$0xf] }
 0x297   : > { %2711 = vst [vmem:[#allocation3 + $0x18] sm:$0xf] %v2710_v17  ;;  %2714 = vst [vmem:[#allocation3 + $0x1c] sm:$0x1] %v2713_v48  ;;  %v2698_v30 = vsel %vm5437_vm9, %v2622_v55, %v2697_v59  ;;  %v2701_v34 = vsel %vm5444_vm10, %v2623_v37, %v2700_v14  ;;  %v2630_v19 = vor.u32 %v2628_v60, %v2627_v43  ;;  %v2631_v21 = vrot.slane %v2627_v43, 4 }
 0x298   : > { %2699 = vst [vmem:[#allocation3 + $0x8] sm:$0xf] %v2698_v30  ;;  %2702 = vst [vmem:[#allocation3 + $0xc] sm:$0x1] %v2701_v34  ;;  %v2716_v32 = vsel %vm5437_vm9, %v2646_v50, %v2715_v56  ;;  %v2719_v36 = vsel %vm5444_vm10, %v2647_v62, %v2718_v13  ;;  %v4619_v38 = vpack.c.bf16 %v2582_v3, %v2582_v3  ;;  %v5867_v42 = vrot.slane %v2772_v24, 5 }
 0x299   : > { %v4617_v26 = vpack.c.bf16 %v2580_v16, %v2580_v16  ;;  %2717 = vst [vmem:[#allocation3 + $0x20] sm:$0xf] %v2716_v32  ;;  %2720 = vst [vmem:[#allocation3 + $0x24] sm:$0x1] %v2719_v36  ;;  %v2704_v45 = vsel %vm5437_vm9, %v2630_v19, %v2703_v29  ;;  %v2707_v9 = vsel %vm5444_vm10, %v2631_v21, %v2706_v6  ;;  %v2742_v56 = vld [vmem:[#allocation3 + $0x44] sm:$0x1] }
 0x29a   : > { %v2575_v46 = vadd.f32 %v4860_v11, %v5823_v15  ;;  %v2573_v33 = vadd.f32 %v5823_v15, %v2541_v57  ;;  %2705 = vst [vmem:[#allocation3 + $0x10] sm:$0xf] %v2704_v45  ;;  %2708 = vst [vmem:[#allocation3 + $0x14] sm:$0x1] %v2707_v9  ;;  %v2665_v47 = vshrl.u32 %v4619_v38, 16  ;;  %v2668_v35 = vshll.u32 %v4619_v38, 16 }
 0x29b   : > { %v2649_v7 = vshrl.u32 %v4617_v26, 16  ;;  %v2652_v18 = vshll.u32 %v4617_v26, 16  ;;  %v5863_v15 = vrot.slane %v2769_v39, 4  ;;  %v2727_v3 = vld [vmem:[#allocation3 + $0x30] sm:$0xf] }
 0x29c   : > { %v2583_v52 = vmax.f32 %v2575_v46, 0.0  ;;  %v2581_v53 = vmax.f32 %v2573_v33, 0.0  ;;  %v2667_v23 = vrot.slane %v2665_v47, 7  ;;  %v2730_v17 = vld [vmem:[#allocation3 + $0x34] sm:$0x1] }
 0x29d   : > { %v2651_v12 = vrot.slane %v2649_v7, 7  ;;  %v2775_v48 = vsel %vm5296_vm3, %v5863_v15, %v5867_v42 }
 0x29e   : > { %v4620_v59 = vpack.c.bf16 %v2583_v52, %v2583_v52  ;;  %v4618_v20 = vpack.c.bf16 %v2581_v53, %v2581_v53  ;;  %v2670_v63 = vor.u32 %v2668_v35, %v2667_v23  ;;  %v2671_v4 = vrot.slane %v2667_v23, 4  ;;  %v5869_v49 = vld [vmem:[#allocation3 + $0x18] sm:$0xf]  ;;  %v5907_v7 = vld [vmem:[#allocation3 + $0x1c] sm:$0x1] }
 0x29f   : > { %v2654_v5 = vor.u32 %v2652_v18, %v2651_v12  ;;  %v2655_v14 = vrot.slane %v2651_v12, 4  ;;  %v5871_v0 = vld [vmem:[#allocation3 + $0x8] sm:$0xf]  ;;  %v5881_v57 = vld [vmem:[#allocation3 + $0xc] sm:$0x1]  ;;  %v2805_v29 = vshrl.u32 %v5869_v49, 16 }
 0x2a0   : > { %v2673_v60 = vshrl.u32 %v4620_v59, 16  ;;  %v2676_v1 = vshll.u32 %v4620_v59, 16  ;;  %v2657_v11 = vshrl.u32 %v4618_v20, 16  ;;  %v2660_v54 = vshll.u32 %v4618_v20, 16  ;;  %v5897_v45 = vld [vmem:[#allocation3 + $0x20] sm:$0xf] }
 0x2a1   : > { %v2734_v8 = vsel %vm5437_vm9, %v2670_v63, %v2733_v51  ;;  %v2737_v41 = vsel %vm5444_vm10, %v2671_v4, %v2736_v22  ;;  %v2722_v39 = vsel %vm5437_vm9, %v2654_v5, %v2721_v25  ;;  %v2725_v24 = vsel %vm5444_vm10, %v2655_v14, %v2724_v58  ;;  %v5885_v16 = vld [vmem:[#allocation3 + $0x10] sm:$0xf]  ;;  %v5894_v21 = vld [vmem:[#allocation3 + $0x14] sm:$0x1]  ;;  %v5912_v35 = vld [vmem:[#allocation3 + $0x24] sm:$0x1] }
 0x2a2   : > { %2735 = vst [vmem:[#allocation3 + $0x38] sm:$0xf] %v2734_v8  ;;  %2738 = vst [vmem:[#allocation3 + $0x3c] sm:$0x1] %v2737_v41  ;;  %v2675_v55 = vrot.slane %v2673_v60, 7  ;;  %v2659_v37 = vrot.slane %v2657_v11, 7 }
 0x2a3   : > { %2723 = vst [vmem:[#allocation3 + $0x28] sm:$0xf] %v2722_v39  ;;  %2726 = vst [vmem:[#allocation3 + $0x2c] sm:$0x1] %v2725_v24  ;;  %v2777_v13 = vshrl.u32 %v5871_v0, 16  ;;  %v2780_v43 = vshll.u32 %v5871_v0, 16 }
 0x2a4   : > { %v2791_v50 = vshrl.u32 %v5885_v16, 16  ;;  %v2794_v62 = vshll.u32 %v5885_v16, 16  ;;  %v2678_v6 = vor.u32 %v2676_v1, %v2675_v55  ;;  %v2679_v30 = vrot.slane %v2675_v55, 4 }
 0x2a5   : > { %v2662_v34 = vor.u32 %v2660_v54, %v2659_v37  ;;  %v2663_v19 = vrot.slane %v2659_v37, 4  ;;  %v2779_v32 = vrot.slane %v2777_v13, 4  ;;  %v2782_v36 = vrot.slane %v2780_v43, 5 }
 0x2a6   : > { %v2786_v38 = vshll.u32 %v5881_v57, 16  ;;  %v2793_v26 = vrot.slane %v2791_v50, 4  ;;  %v2740_v9 = vsel %vm5437_vm9, %v2678_v6, %v2739_v44  ;;  %v2743_v46 = vsel %vm5444_vm10, %v2679_v30, %v2742_v56 }
 0x2a7   : > { %v2728_v33 = vsel %vm5437_vm9, %v2662_v34, %v2727_v3  ;;  %v2731_v47 = vsel %vm5444_vm10, %v2663_v19, %v2730_v17  ;;  %2741 = vst [vmem:[#allocation3 + $0x40] sm:$0xf] %v2740_v9  ;;  %2744 = vst [vmem:[#allocation3 + $0x44] sm:$0x1] %v2743_v46  ;;  %v2783_v51 = vor.u32 %v2782_v36, %v2779_v32  ;;  %v2796_v52 = vrot.slane %v2794_v62, 5 }
 0x2a8   : > { %2729 = vst [vmem:[#allocation3 + $0x30] sm:$0xf] %v2728_v33  ;;  %2732 = vst [vmem:[#allocation3 + $0x34] sm:$0x1] %v2731_v47  ;;  %v2800_v53 = vshll.u32 %v5894_v21, 16  ;;  %v3001_v23 = vsel %vm1218_vm6, %v5814_v27, 0 }
 0x2a9   : > { %v2807_v2 = vrot.slane %v2805_v29, 4  ;;  %v2808_v22 = vshll.u32 %v5869_v49, 16  ;;  %v2819_v61 = vshrl.u32 %v5897_v45, 16  ;;  %v2822_v12 = vshll.u32 %v5897_v45, 16  ;;  %v5926_v11 = vld [vmem:[#allocation3 + $0x38] sm:$0xf] }
 0x2aa   : > { %v2784_v18 = vrot.slane %v2783_v51, 4  ;;  %v2788_v25 = vrot.slane %v2786_v38, 5  ;;  %v2797_v58 = vor.u32 %v2796_v52, %v2793_v26  ;;  %v2814_v59 = vshll.u32 %v5907_v7, 16  ;;  %v5918_v20 = vld [vmem:[#allocation3 + $0x28] sm:$0xf] }
 0x2ab   : > { %v2802_v15 = vrot.slane %v2800_v53, 5  ;;  %v2810_v42 = vrot.slane %v2808_v22, 5  ;;  %v5920_v63 = vld [vmem:[#allocation3 + $0x2c] sm:$0x1]  ;;  %v2821_v27 = vrot.slane %v2819_v61, 4  ;;  %v2824_v4 = vrot.slane %v2822_v12, 5 }
 0x2ac   : > { %v2789_v5 = vsel %vm5296_vm3, %v2784_v18, %v2788_v25  ;;  %v2798_v14 = vrot.slane %v2797_v58, 4  ;;  %v2828_v60 = vshll.u32 %v5912_v35, 16  ;;  %v2833_v1 = vshrl.u32 %v5918_v20, 16  ;;  %v5931_v3 = vld [vmem:[#allocation3 + $0x3c] sm:$0x1] }
 0x2ad   : > { %v4498_v54 = vcombine.low %v2775_v48, %v2789_v5  ;;  %v2811_v8 = vor.u32 %v2810_v42, %v2807_v2  ;;  %v2825_v41 = vor.u32 %v2824_v4, %v2821_v27  ;;  %v2836_v39 = vshll.u32 %v5918_v20, 16  ;;  %v4522_v36 = vld [vmem:[%s6216_s5 + $0x8] sm:$0xf]  ;;  %v3068_v4 = vld [vmem:[#allocation3] sm:$0xe] }
 0x2ae   : > { %v2803_v24 = vsel %vm5296_vm3, %v2798_v14, %v2802_v15  ;;  %v2816_v44 = vrot.slane %v2814_v59, 5  ;;  %v2835_v56 = vrot.slane %v2833_v1, 4  ;;  %v2842_v13 = vshll.u32 %v5920_v63, 16  ;;  %v3069_v5 = vld [vmem:[#allocation3 + $0x8] sm:$0xe] }
 0x2af   : > { %4863 = vmatprep.mubr.msk.bf16.mxu0 %vm1205_vm11, %v4498_v54  ;;  %v2812_v55 = vrot.slane %v2811_v8, 4  ;;  %v2838_v37 = vrot.slane %v2836_v39, 5  ;;  %v5935_v43 = vld [vmem:[#allocation3 + $0x30] sm:$0xf]  ;;  %v2861_v17 = vshrl.u32 %v5926_v11, 16  ;;  %v2830_v48 = vrot.slane %v2828_v60, 5 }
 0x2b0   : > { %v5938_v50 = vld [vmem:[#allocation3 + $0x34] sm:$0x1]  ;;  %v2847_v62 = vshrl.u32 %v5935_v43, 16  ;;  %v2850_v29 = vshll.u32 %v5935_v43, 16  ;;  %v2864_v6 = vshll.u32 %v5926_v11, 16  ;;  %v2826_v34 = vrot.slane %v2825_v41, 4 }
 0x2b1   : > { %v2817_v30 = vsel %vm5296_vm3, %v2812_v55, %v2816_v44  ;;  %v2839_v19 = vor.u32 %v2838_v37, %v2835_v56  ;;  %v2856_v32 = vshll.u32 %v5938_v50, 16  ;;  %v2863_v46 = vrot.slane %v2861_v17, 4  ;;  %v4531_v54 = vld [vmem:[%s6216_s5 + $0xc] sm:$0xf]  ;;  %v3072_v56 = vld [vmem:[#allocation3 + $0x20] sm:$0xe] }
 0x2b2   : > { %v4499_v38 = vcombine.low %v2803_v24, %v2817_v30  ;;  %v2849_v26 = vrot.slane %v2847_v62, 4  ;;  %v2852_v9 = vrot.slane %v2850_v29, 5  ;;  %v2844_v47 = vrot.slane %v2842_v13, 5 }
 0x2b3   : > { %v2840_v33 = vrot.slane %v2839_v19, 4  ;;  %v2866_v51 = vrot.slane %v2864_v6, 5  ;;  %v2870_v52 = vshll.u32 %v5931_v3, 16  ;;  %v2831_v2 = vsel %vm5296_vm3, %v2826_v34, %v2830_v48 }
 0x2b4   : > { %4864 = vmatmul.mubr.msk.bf16.vlgmr.msra.gmra.mrb[8].mxu0 %vm1205_vm11, %v4499_v38  ;;  %v2853_v53 = vor.u32 %v2852_v9, %v2849_v26  ;;  %v2858_v25 = vrot.slane %v2856_v32, 5  ;;  %v4506_v27 = vcombine.low %v5818_v28, %v5871_v0  ;;  %v4507_v14 = vcombine.low %v5885_v16, %v5869_v49  ;;  %v4540_v32 = vld [vmem:[%s6216_s5 + $0x10] sm:$0xf]  ;;  %v3346_v26 = vld [vmem:[#allocation3 + $0x10] sm:$0xf] }
 0x2b5   : > { %4872 = vmatpush3.bf16.msra.mxu0 %v3001_v23  ;;  %v2845_v22 = vsel %vm5296_vm3, %v2840_v33, %v2844_v47  ;;  %v2867_v61 = vor.u32 %v2866_v51, %v2863_v46  ;;  %v2872_v59 = vrot.slane %v2870_v52, 5  ;;  %v3151_v60 = vsel %vm1218_vm6, %v4522_v36, 0  ;;  %v3344_v46 = vld [vmem:[#allocation3 + $0x8] sm:$0xf] }
 0x2b6   : > { %v4500_v12 = vcombine.low %v2831_v2, %v2845_v22  ;;  %v2854_v18 = vrot.slane %v2853_v53, 4  ;;  %5114 = vmatprep.subr.msk.bf16.mxu0 %vm1218_vm6, %v4522_v36  ;;  %v4508_v1 = vcombine.low %v5897_v45, %v5918_v20  ;;  %v4514_v28 = vrot.slane %v3068_v4, 9  ;;  %v3070_v45 = vld [vmem:[#allocation3 + $0x10] sm:$0xe]  ;;  %v3073_v20 = vld [vmem:[#allocation3 + $0x28] sm:$0xe] }
 0x2b7   : > { %v2868_v58 = vrot.slane %v2867_v61, 4  ;;  %v3094_v0 = vrot.slane %v5835_v10, 5  ;;  %v4515_v8 = vrot.slane %v3069_v5, 9  ;;  %v3098_v41 = vrot.slane %v5881_v57, 5  ;;  %v3071_v10 = vld [vmem:[#allocation3 + $0x18] sm:$0xe] }
 0x2b8   : > { %4867 = vmatprep.mubr.msk.bf16.mxu0 %vm1205_vm11, %v4500_v12  ;;  %v2859_v15 = vsel %vm5296_vm3, %v2854_v18, %v2858_v25  ;;  %v4509_v39 = vcombine.low %v5935_v43, %v5926_v11  ;;  %v4516_v44 = vrot.slane %v3070_v45, 9  ;;  %v3102_v57 = vrot.slane %v5894_v21, 5  ;;  %v3074_v43 = vld [vmem:[#allocation3 + $0x30] sm:$0xe]  ;;  %v3350_v61 = vld [vmem:[#allocation3 + $0x20] sm:$0xf] }
 0x2b9   : > { %v2873_v23 = vsel %vm5296_vm3, %v2868_v58, %v2872_v59  ;;  %v3095_v49 = vsel %vm5587_vm14, %v4514_v28, %v3094_v0  ;;  %v3099_v16 = vsel %vm5587_vm14, %v4515_v8, %v3098_v41  ;;  %v4519_v55 = vrot.slane %v3073_v20, 9  ;;  %v5159_v2 = vld [vmem:[#allocation3 + $0x8] ss:$8 sps:$4 sm:$0xff]   ;;  %v3348_v58 = vld [vmem:[#allocation3 + $0x18] sm:$0xf] }
 0x2ba   : > { %v4501_v42 = vcombine.low %v2859_v15, %v2873_v23  ;;  %v4523_v24 = vcombine.low %v3095_v49, %v3099_v16  ;;  %v3114_v37 = vrot.slane %v5920_v63, 5  ;;  %v4517_v13 = vrot.slane %v3071_v10, 9  ;;  %v3354_v12 = vld [vmem:[#allocation3 + $0x30] sm:$0xf]  ;;  %v6013_v59 = vld [vmem:[#allocation3 + $0x14] sm:$0x1] }
 0x2bb   : > { %v3106_v17 = vrot.slane %v5907_v7, 5  ;;  %v4518_v48 = vrot.slane %v3072_v56, 9  ;;  %v3110_v62 = vrot.slane %v5912_v35, 5  ;;  %v3103_v11 = vsel %vm5587_vm14, %v4516_v44, %v3102_v57  ;;  %v3075_v7 = vld [vmem:[#allocation3 + $0x38] sm:$0xe] }
 0x2bc   : > { %4868 = vmatmul.mubr.msk.bf16.gmra.mrb[12].mxu0 %vm1205_vm11, %v4501_v42  ;;  %v3115_v21 = vsel %vm5587_vm14, %v4519_v55, %v3114_v37  ;;  %v3269_v63 = vsel %vm1218_vm6, %v4531_v54, 0  ;;  %v4520_v19 = vrot.slane %v3074_v43, 9  ;;  %v3118_v35 = vrot.slane %v5938_v50, 5  ;;  %v3352_v42 = vld [vmem:[#allocation3 + $0x28] sm:$0xf] }
 0x2bd   : > { %4873 = vmatprep.mubr.msk.bf16.mxu0 %vm1205_vm11, %v4506_v27  ;;  %v3107_v29 = vsel %vm5587_vm14, %v4517_v13, %v3106_v17  ;;  %v3111_v30 = vsel %vm5587_vm14, %v4518_v48, %v3110_v62  ;;  %v4521_v36 = vrot.slane %v3075_v7, 9  ;;  %v3122_v38 = vrot.slane %v5931_v3, 5  ;;  %v5160_v28 = vld [vmem:[#allocation3 + $0x18] ss:$8 sps:$4 sm:$0xff]   ;;  %v5161_v16 = vld [vmem:[#allocation3 + $0x28] ss:$8 sps:$4 sm:$0xff]  }
 0x2be   : > { %v4524_v6 = vcombine.low %v3103_v11, %v3107_v29  ;;  %v4525_v34 = vcombine.low %v3111_v30, %v3115_v21  ;;  %v3119_v9 = vsel %vm5587_vm14, %v4520_v19, %v3118_v35  ;;  %v3375_v50 = vshrl.u32 %v3346_v26, 16  ;;  %v6022_v45 = vld [vmem:[%s6216_s5 + $0x14] sm:$0xf]  ;;  %v3358_v56 = vld [vmem:[#allocation3 + $0x40] sm:$0xf] }
 0x2bf   : > { %v3378_v33 = vshll.u32 %v3346_v26, 16  ;;  %v3123_v47 = vsel %vm5587_vm14, %v4521_v36, %v3122_v38  ;;  %v3361_v52 = vshrl.u32 %v3344_v46, 16  ;;  %v3364_v53 = vshll.u32 %v3344_v46, 16  ;;  %v6027_v55 = vld [vmem:[#allocation3 + $0x24] sm:$0x1] }
 0x2c0   : > { %v4526_v51 = vcombine.low %v3119_v9, %v3123_v47  ;;  %v3377_v22 = vrot.slane %v3375_v50, 4  ;;  %v3403_v15 = vshrl.u32 %v3350_v61, 16  ;;  %v3406_v23 = vshll.u32 %v3350_v61, 16  ;;  %v3356_v21 = vld [vmem:[#allocation3 + $0x38] sm:$0xf] }
 0x2c1   : > { %v3380_v3 = vrot.slane %v3378_v33, 5  ;;  %v3363_v18 = vrot.slane %v3361_v52, 4  ;;  %v3366_v25 = vrot.slane %v3364_v53, 5  ;;  %v3431_v4 = vshrl.u32 %v3354_v12, 16  ;;  %v6031_v43 = vld [vmem:[#allocation3 + $0x1c] sm:$0x1] }
 0x2c2   : > { %v3434_v5 = vshll.u32 %v3354_v12, 16  ;;  %v3384_v8 = vshll.u32 %v6013_v59, 16  ;;  %v3417_v41 = vshrl.u32 %v3352_v42, 16  ;;  %v3420_v49 = vshll.u32 %v3352_v42, 16  ;;  %v6038_v36 = vld [vmem:[#allocation3 + $0x2c] sm:$0x1] }
 0x2c3   : > { %v3381_v27 = vor.u32 %v3380_v3, %v3377_v22  ;;  %v3367_v0 = vor.u32 %v3366_v25, %v3363_v18  ;;  %v3405_v20 = vrot.slane %v3403_v15, 4  ;;  %v3433_v44 = vrot.slane %v3431_v4, 4  ;;  %v5162_v9 = vld [vmem:[#allocation3 + $0x38] ss:$8 sps:$4 sm:$0xff]  }
 0x2c4   : > { %4874 = vmatmul.mubr.msk.bf16.vlgmr.msra.gmra.mrb[8].mxu0 %vm1205_vm11, %v4507_v14  ;;  %v3499_v14 = vsel %vm1218_vm6, %v4540_v32, 0  ;;  %v3436_v57 = vrot.slane %v3434_v5, 5  ;;  %v3386_v48 = vrot.slane %v3384_v8, 5  ;;  %v3419_v62 = vrot.slane %v3417_v41, 4  ;;  %v3575_v8 = vld [vmem:[#allocation3 + $0x10] sm:$0xe] }
 0x2c5   : > { %4882 = vmatpush3.bf16.msra.mxu0 %v3151_v60  ;;  %4877 = vmatprep.mubr.msk.bf16.mxu0 %vm1205_vm11, %v4508_v1  ;;  %v6016_v60 = vld [vmem:[#allocation3 + $0xc] sm:$0x1]  ;;  %v3389_v1 = vshrl.u32 %v3348_v58, 16  ;;  %v3368_v17 = vrot.slane %v3367_v0, 4  ;;  %v3422_v11 = vrot.slane %v3420_v49, 5  ;;  %v3462_v30 = vshll.u32 %v3358_v56, 16 }
 0x2c6   : > { %5115 = vmatprep.subr.msk.bf16.mxu0 %vm1218_vm6, %v4531_v54  ;;  %v3392_v54 = vshll.u32 %v3348_v58, 16  ;;  %v3370_v10 = vshll.u32 %v6016_v60, 16  ;;  %v3437_v19 = vor.u32 %v3436_v57, %v3433_v44  ;;  %v3445_v38 = vshrl.u32 %v3356_v21, 16  ;;  %v4566_v44 = vld [vmem:[%s6216_s5 + $0x18] sm:$0xf] }
 0x2c7   : > { %v3391_v37 = vrot.slane %v3389_v1, 4  ;;  %v3448_v26 = vshll.u32 %v3356_v21, 16  ;;  %v3398_v50 = vshll.u32 %v6031_v43, 16  ;;  %v3423_v33 = vor.u32 %v3422_v11, %v3419_v62  ;;  %v6053_v1 = vld [vmem:[#allocation3 + $0x3c] sm:$0x1] }
 0x2c8   : > { %v3394_v13 = vrot.slane %v3392_v54, 5  ;;  %v3372_v7 = vrot.slane %v3370_v10, 5  ;;  %v3426_v22 = vshll.u32 %v6038_v36, 16  ;;  %v3438_v3 = vrot.slane %v3437_v19, 4  ;;  %v3577_v21 = vld [vmem:[#allocation3 + $0x20] sm:$0xe] }
 0x2c9   : > { %v3447_v18 = vrot.slane %v3445_v38, 4  ;;  %v3450_v25 = vrot.slane %v3448_v26, 5  ;;  %v3424_v58 = vrot.slane %v3423_v33, 4  ;;  %v3400_v42 = vrot.slane %v3398_v50, 5 }
 0x2ca   : > { %v3395_v35 = vor.u32 %v3394_v13, %v3391_v37  ;;  %v3373_v46 = vsel %vm5296_vm3, %v3368_v17, %v3372_v7  ;;  %v3428_v5 = vrot.slane %v3426_v22, 5  ;;  %v3657_v49 = vsel %vm1218_vm6, %v6022_v45, 0  ;;  %v3576_v7 = vld [vmem:[#allocation3 + $0x18] sm:$0xe] }
 0x2cb   : > { %v4550_v57 = vrot.slane %v3575_v8, 9  ;;  %v3600_v17 = vrot.slane %v6016_v60, 5  ;;  %v3612_v19 = vrot.slane %v6027_v55, 5  ;;  %v4551_v26 = vrot.slane %v3576_v7, 9 }
 0x2cc   : > { %4878 = vmatmul.mubr.msk.bf16.gmra.mrb[12].mxu0 %vm1205_vm11, %v4509_v39  ;;  %v3408_v39 = vrot.slane %v3406_v23, 5  ;;  %v3396_v61 = vrot.slane %v3395_v35, 4  ;;  %v6047_v23 = vld [vmem:[#allocation3 + $0x44] sm:$0x1]  ;;  %v3578_v35 = vld [vmem:[#allocation3 + $0x28] sm:$0xe] }
 0x2cd   : > { %4883 = vmatprep.mubr.msk.bf16.mxu0 %vm1205_vm11, %v4523_v24  ;;  %v3382_v24 = vrot.slane %v3381_v27, 4  ;;  %v3468_v0 = vshll.u32 %v6047_v23, 16  ;;  %v3616_v50 = vrot.slane %v6038_v36, 5  ;;  %v3628_v36 = vrot.slane %v6047_v23, 5 }
 0x2ce   : > { %v3409_v29 = vor.u32 %v3408_v39, %v3405_v20  ;;  %v3401_v54 = vsel %vm5296_vm3, %v3396_v61, %v3400_v42  ;;  %v3454_v39 = vshll.u32 %v6053_v1, 16 }
 0x2cf   : > { %v3470_v37 = vrot.slane %v3468_v0, 5  ;;  %v3859_v0 = vld [vmem:[#allocation3 + $0x30] sm:$0xf] }
 0x2d0   : > { %v3410_v52 = vrot.slane %v3409_v29, 4  ;;  %v3579_v29 = vld [vmem:[#allocation3 + $0x30] sm:$0xe] }
 0x2d4   : > { %4884 = vmatmul.mubr.msk.bf16.vlgmr.msra.gmra.mrb[8].mxu0 %vm1205_vm11, %v4524_v6  ;;  %v6033_v6 = vld [vmem:[#allocation3 + $0x34] sm:$0x1] }
 0x2d5   : > { %4892 = vmatpush3.bf16.msra.mxu0 %v3269_v63  ;;  %4887 = vmatprep.mubr.msk.bf16.mxu0 %vm1205_vm11, %v4525_v34  ;;  %v3459_v63 = vshrl.u32 %v3358_v56, 16  ;;  %v3387_v34 = vsel %vm5296_vm3, %v3382_v24, %v3386_v48  ;;  %v3440_v47 = vshll.u32 %v6033_v6, 16  ;;  %v3574_v24 = vld [vmem:[#allocation3 + $0x8] sm:$0xe]  ;;  %v3604_v56 = vrot.slane %v6013_v59, 5 }
 0x2d6   : > { %5116 = vmatprep.subr.msk.bf16.mxu0 %vm1218_vm6, %v4540_v32  ;;  %v3412_v32 = vshll.u32 %v6027_v55, 16  ;;  %v4549_v13 = vrot.slane %v3574_v24, 9  ;;  %v3456_v48 = vrot.slane %v3454_v39, 5  ;;  %v3620_v38 = vrot.slane %v6033_v6, 5 }
 0x2d7   : > { %v3461_v53 = vrot.slane %v3459_v63, 4  ;;  %v3442_v15 = vrot.slane %v3440_v47, 5  ;;  %v3605_v11 = vsel %vm5587_vm14, %v4550_v57, %v3604_v56  ;;  %v3581_v47 = vld [vmem:[#allocation3 + $0x40] sm:$0xe]  ;;  %v3776_v6 = vsel %vm1218_vm6, %v4566_v44, 0 }
 0x2d8   : > { %v3414_v12 = vrot.slane %v3412_v32, 5  ;;  %v4554_v32 = vrot.slane %v3579_v29, 9  ;;  %v4556_v22 = vrot.slane %v3581_v47, 9  ;;  %v3927_v57 = vshll.u32 %v3859_v0, 16  ;;  %v3865_v56 = vld [vmem:[#allocation3 + $0x48] sm:$0xf] }
 0x2d9   : > { %v5165_v29 = vld [vmem:[#allocation3 + $0x30] ss:$8 sps:$4 sm:$0xff]  }
 0x2da   : > { %v3415_v27 = vsel %vm5296_vm3, %v3410_v52, %v3414_v12  ;;  %v3621_v55 = vsel %vm5587_vm14, %v4554_v32, %v3620_v38  ;;  %v3624_v12 = vrot.slane %v6053_v1, 5  ;;  %v3863_v32 = vld [vmem:[#allocation3 + $0x40] sm:$0xf] }
 0x2db   : > { %v4542_v41 = vcombine.low %v3401_v54, %v3415_v27 }
 0x2dc   : > { %4888 = vmatmul.mubr.msk.bf16.gmra.mrb[12].mxu0 %vm1205_vm11, %v4526_v51  ;;  %v4541_v51 = vcombine.low %v3373_v46, %v3387_v34  ;;  %v4552_v34 = vrot.slane %v3577_v21, 9  ;;  %v4553_v46 = vrot.slane %v3578_v35, 9  ;;  %v3929_v35 = vrot.slane %v3927_v57, 5 }
 0x2dd   : > { %4893 = vmatprep.mubr.msk.bf16.mxu0 %vm1205_vm11, %v5159_v2  ;;  %v3464_v2 = vrot.slane %v3462_v30, 5  ;;  %v3601_v30 = vsel %vm5587_vm14, %v4549_v13, %v3600_v17 }
 0x2de   : > { %v4558_v60 = vcombine.low %v3601_v30, %v3605_v11  ;;  %v3613_v33 = vsel %vm5587_vm14, %v4552_v34, %v3612_v19 }
 0x2df   : > { %v3465_v4 = vor.u32 %v3464_v2, %v3461_v53  ;;  %v3617_v53 = vsel %vm5587_vm14, %v4553_v46, %v3616_v50  ;;  %v3969_v46 = vshll.u32 %v3865_v56, 16 }
 0x2e0   : > { %v4560_v2 = vcombine.low %v3617_v53, %v3621_v55  ;;  %v6124_v55 = vld [vmem:[#allocation3 + $0x2c] sm:$0x1]  ;;  %v6128_v53 = vld [vmem:[#allocation3 + $0x34] sm:$0x1] }
 0x2e1   : > { %v3466_v10 = vrot.slane %v3465_v4, 4  ;;  %v4123_v40 = vrot.slane %v6128_v53, 5 }
 0x2e3   : > { %v3471_v62 = vsel %vm5296_vm3, %v3466_v10, %v3470_v37  ;;  %v3861_v10 = vld [vmem:[#allocation3 + $0x38] sm:$0xf]  ;;  %v6111_v37 = vld [vmem:[#allocation3 + $0x1c] sm:$0x1] }
 0x2e4   : > { %4894 = vmatmul.mubr.msk.bf16.vlgmr.msra.gmra.mrb[8].mxu0 %vm1205_vm11, %v5160_v28  ;;  %v3451_v28 = vor.u32 %v3450_v25, %v3447_v18  ;;  %v3851_v18 = vld [vmem:[#allocation3 + $0x10] sm:$0xf]  ;;  %v3629_v25 = vsel %vm5587_vm14, %v4556_v22, %v3628_v36  ;;  %v3938_v21 = vshrl.u32 %v3861_v10, 16  ;;  %v3891_v34 = vshll.u32 %v6111_v37, 16 }
 0x2e5   : > { %4902 = vmatpush3.bf16.msra.mxu0 %v3499_v14  ;;  %4897 = vmatprep.mubr.msk.bf16.mxu0 %vm1205_vm11, %v5161_v16  ;;  %v3443_v14 = vsel %vm5296_vm3, %v3438_v3, %v3442_v15  ;;  %v3429_v16 = vsel %vm5296_vm3, %v3424_v58, %v3428_v5  ;;  %v4575_v3 = vld [vmem:[%s6216_s5 + $0x1c] sm:$0xf]  ;;  %v3853_v58 = vld [vmem:[#allocation3 + $0x18] sm:$0xf]  ;;  %v3868_v15 = vshrl.u32 %v3851_v18, 16  ;;  %v3871_v23 = vshll.u32 %v3851_v18, 16 }
 0x2e6   : > { %5117 = vmatprep.subr.msk.bf16.mxu0 %vm1218_vm6, %v6022_v45  ;;  %v4543_v20 = vcombine.low %v3429_v16, %v3443_v14  ;;  %v3452_v45 = vrot.slane %v3451_v28, 4  ;;  %v3882_v4 = vshrl.u32 %v3853_v58, 16  ;;  %v3885_v5 = vshll.u32 %v3853_v58, 16  ;;  %v5163_v14 = vld [vmem:[#allocation3 + $0x10] ss:$8 sps:$4 sm:$0xff]  }
 0x2e7   : > { %v3870_v54 = vrot.slane %v3868_v15, 4  ;;  %v3873_v1 = vrot.slane %v3871_v23, 5  ;;  %v3857_v28 = vld [vmem:[#allocation3 + $0x28] sm:$0xf]  ;;  %v6108_v16 = vld [vmem:[#allocation3 + $0x14] sm:$0x1] }
 0x2e8   : > { %v3457_v59 = vsel %vm5296_vm3, %v3452_v45, %v3456_v48  ;;  %v3884_v8 = vrot.slane %v3882_v4, 4  ;;  %v3913_v39 = vshll.u32 %v3857_v28, 16  ;;  %v4006_v45 = vsel %vm1218_vm6, %v4575_v3, 0  ;;  %v5164_v48 = vld [vmem:[#allocation3 + $0x20] ss:$8 sps:$4 sm:$0xff]  }
 0x2e9   : > { %v4544_v63 = vcombine.low %v3457_v59, %v3471_v62  ;;  %v3874_v24 = vor.u32 %v3873_v1, %v3870_v54  ;;  %v3877_v62 = vshll.u32 %v6108_v16, 16  ;;  %v3941_v59 = vshll.u32 %v3861_v10, 16  ;;  %v6133_v18 = vld [vmem:[#allocation3 + $0x3c] sm:$0x1]  ;;  %v5166_v15 = vld [vmem:[#allocation3 + $0x40] ss:$8 sps:$4 sm:$0xff]  }
 0x2ea   : > { %v3915_v7 = vrot.slane %v3913_v39, 5  ;;  %v3940_v47 = vrot.slane %v3938_v21, 4  ;;  %v3893_v36 = vrot.slane %v3891_v34, 5  ;;  %v3971_v58 = vrot.slane %v3969_v46, 5  ;;  %v6142_v39 = vld [vmem:[#allocation3 + $0x44] sm:$0x1] }
 0x2eb   : > { %v3879_v50 = vrot.slane %v3877_v62, 5  ;;  %v6144_v10 = vld [vmem:[#allocation3 + $0x4c] sm:$0x1]  ;;  %v3961_v62 = vshll.u32 %v6142_v39, 16 }
 0x2ec   : > { %4898 = vmatmul.mubr.msk.bf16.gmra.mrb[12].mxu0 %vm1205_vm11, %v5162_v9  ;;  %v3608_v9 = vrot.slane %v6031_v43, 5  ;;  %v3580_v43 = vld [vmem:[#allocation3 + $0x38] sm:$0xe] }
 0x2ed   : > { %4903 = vmatprep.mubr.msk.bf16.mxu0 %vm1205_vm11, %v4541_v51  ;;  %v4555_v61 = vrot.slane %v3580_v43, 9  ;;  %v3952_v43 = vshrl.u32 %v3863_v32, 16 }
 0x2ee   : > { %v3609_v51 = vsel %vm5587_vm14, %v4551_v26, %v3608_v9  ;;  %v3966_v9 = vshrl.u32 %v3865_v56, 16 }
 0x2ef   : > { %v4559_v52 = vcombine.low %v3609_v51, %v3613_v33  ;;  %v3625_v42 = vsel %vm5587_vm14, %v4555_v61, %v3624_v12  ;;  %v3943_v51 = vrot.slane %v3941_v59, 5  ;;  %v3919_v12 = vshll.u32 %v6124_v55, 16 }
 0x2f0   : > { %v4561_v27 = vcombine.low %v3625_v42, %v3629_v25  ;;  %v3968_v25 = vrot.slane %v3966_v9, 4  ;;  %v3954_v54 = vrot.slane %v3952_v43, 4 }
 0x2f1   : > { %v3944_v4 = vor.u32 %v3943_v51, %v3940_v47  ;;  %v4085_v47 = vld [vmem:[#allocation3 + $0x30] sm:$0xe] }
 0x2f4   : > { %4904 = vmatmul.mubr.msk.bf16.vlgmr.msra.gmra.mrb[8].mxu0 %vm1205_vm11, %v4542_v41  ;;  %v3887_v41 = vrot.slane %v3885_v5, 5 }
 0x2f5   : > { %4912 = vmatpush3.bf16.msra.mxu0 %v3657_v49  ;;  %4907 = vmatprep.mubr.msk.bf16.mxu0 %vm1205_vm11, %v4543_v20  ;;  %v3855_v49 = vld [vmem:[#allocation3 + $0x20] sm:$0xf]  ;;  %v3910_v20 = vshrl.u32 %v3857_v28, 16 }
 0x2f6   : > { %5118 = vmatprep.subr.msk.bf16.mxu0 %vm1218_vm6, %v4566_v44  ;;  %v3924_v44 = vshrl.u32 %v3859_v0, 16  ;;  %v3896_v13 = vshrl.u32 %v3855_v49, 16  ;;  %v3899_v17 = vshll.u32 %v3855_v49, 16  ;;  %v3888_v11 = vor.u32 %v3887_v41, %v3884_v8 }
 0x2f7   : > { %v3912_v30 = vrot.slane %v3910_v20, 4  ;;  %v3947_v0 = vshll.u32 %v6133_v18, 16  ;;  %v3921_v41 = vrot.slane %v3919_v12, 5  ;;  %v3945_v20 = vrot.slane %v3944_v4, 4 }
 0x2f8   : > { %v3926_v19 = vrot.slane %v3924_v44, 4  ;;  %v3898_v38 = vrot.slane %v3896_v13, 4  ;;  %v3901_v26 = vrot.slane %v3899_v17, 5  ;;  %v3889_v33 = vrot.slane %v3888_v11, 4  ;;  %v4081_v11 = vld [vmem:[#allocation3 + $0x10] sm:$0xe] }
 0x2f9   : > { %v3949_v17 = vrot.slane %v3947_v0, 5  ;;  %v4601_v0 = vld [vmem:[%s6217_s6] ss:$0 sm:$0xff] }
 0x2fa   : > { %v3902_v61 = vor.u32 %v3901_v26, %v3898_v38  ;;  %v3894_v23 = vsel %vm5296_vm3, %v3889_v33, %v3893_v36  ;;  %v3963_v38 = vrot.slane %v3961_v62, 5  ;;  %v4084_v33 = vld [vmem:[#allocation3 + $0x28] sm:$0xe]  ;;  %v4588_v36 = vrot.slane %v4085_v47, 9 }
 0x2fc   : > { %4908 = vmatmul.mubr.msk.bf16.gmra.mrb[12].mxu0 %vm1205_vm11, %v4544_v63  ;;  %v6117_v63 = vld [vmem:[%s6216_s5 + $0x20] sm:$0xf]  ;;  %v3903_v8 = vrot.slane %v3902_v61, 4 }
 0x2fd   : > { %4913 = vmatprep.mubr.msk.bf16.mxu0 %vm1205_vm11, %v4558_v60  ;;  %v3875_v60 = vrot.slane %v3874_v24, 4  ;;  %v3972_v24 = vor.u32 %v3971_v58, %v3968_v25  ;;  %v4164_v59 = vsel %vm1218_vm6, %v6117_v63, 0  ;;  %v4127_v25 = vrot.slane %v6133_v18, 5 }
 0x2fe   : > { %v4131_v18 = vrot.slane %v6142_v39, 5 }
 0x2ff   : > { %v3880_v22 = vsel %vm5296_vm3, %v3875_v60, %v3879_v50  ;;  %v3973_v60 = vrot.slane %v3972_v24, 4 }
 0x300   : > { %v4576_v5 = vcombine.low %v3880_v22, %v3894_v23  ;;  %v4086_v22 = vld [vmem:[#allocation3 + $0x38] sm:$0xe]  ;;  %v4087_v23 = vld [vmem:[#allocation3 + $0x40] sm:$0xe] }
 0x301   : > { %v4589_v12 = vrot.slane %v4086_v22, 9 }
 0x304   : > { %4914 = vmatmul.mubr.msk.bf16.vlgmr.msra.gmra.mrb[8].mxu0 %vm1205_vm11, %v4559_v52  ;;  %v6126_v52 = vld [vmem:[#allocation3 + $0x24] sm:$0x1] }
 0x305   : > { %4922 = vmatpush3.bf16.msra.mxu0 %v3776_v6  ;;  %4917 = vmatprep.mubr.msk.bf16.mxu0 %vm1205_vm11, %v4560_v2  ;;  %v3916_v6 = vor.u32 %v3915_v7, %v3912_v30  ;;  %v3955_v2 = vshll.u32 %v3863_v32, 16  ;;  %v3905_v42 = vshll.u32 %v6126_v52, 16  ;;  %v4107_v32 = vrot.slane %v6108_v16, 5 }
 0x306   : > { %5119 = vmatprep.subr.msk.bf16.mxu0 %vm1218_vm6, %v4575_v3  ;;  %v3930_v3 = vor.u32 %v3929_v35, %v3926_v19  ;;  %v4082_v19 = vld [vmem:[#allocation3 + $0x18] sm:$0xe]  ;;  %v4584_v35 = vrot.slane %v4081_v11, 9  ;;  %v4115_v61 = vrot.slane %v6126_v52, 5 }
 0x307   : > { %v3957_v1 = vrot.slane %v3955_v2, 5  ;;  %v3907_v44 = vrot.slane %v3905_v42, 5  ;;  %v4585_v26 = vrot.slane %v4082_v19, 9  ;;  %v4587_v2 = vrot.slane %v4084_v33, 9 }
 0x308   : > { %v3931_v28 = vrot.slane %v3930_v3, 4  ;;  %v4108_v50 = vsel %vm5587_vm14, %v4584_v35, %v4107_v32 }
 0x309   : > { %v3958_v56 = vor.u32 %v3957_v1, %v3954_v54 }
 0x30b   : > { %v3959_v7 = vrot.slane %v3958_v56, 4 }
 0x30c   : > { %4918 = vmatmul.mubr.msk.bf16.gmra.mrb[12].mxu0 %vm1205_vm11, %v4561_v27  ;;  %v3933_v27 = vshll.u32 %v6128_v53, 16 }
 0x30d   : > { %4923 = vmatprep.mubr.msk.bf16.mxu0 %vm1205_vm11, %v5163_v14  ;;  %v3917_v14 = vrot.slane %v3916_v6, 4  ;;  %v3964_v9 = vsel %vm5296_vm3, %v3959_v7, %v3963_v38  ;;  %v4083_v6 = vld [vmem:[#allocation3 + $0x20] sm:$0xe] }
 0x30e   : > { %v3935_v49 = vrot.slane %v3933_v27, 5  ;;  %v4586_v3 = vrot.slane %v4083_v6, 9  ;;  %v4128_v27 = vsel %vm5587_vm14, %v4589_v12, %v4127_v25 }
 0x30f   : > { %v3922_v57 = vsel %vm5296_vm3, %v3917_v14, %v3921_v41  ;;  %v4135_v14 = vrot.slane %v6144_v10, 5 }
 0x310   : > { %v3936_v13 = vsel %vm5296_vm3, %v3931_v28, %v3935_v49  ;;  %v4116_v53 = vsel %vm5587_vm14, %v4586_v3, %v4115_v61 }
 0x314   : > { %4924 = vmatmul.mubr.msk.bf16.vlgmr.msra.gmra.mrb[8].mxu0 %vm1205_vm11, %v5164_v48  ;;  %v3908_v48 = vsel %vm5296_vm3, %v3903_v8, %v3907_v44 }
 0x315   : > { %4932 = vmatpush3.bf16.msra.mxu0 %v4006_v45  ;;  %4927 = vmatprep.mubr.msk.bf16.mxu0 %vm1205_vm11, %v5165_v29  ;;  %v3975_v45 = vshll.u32 %v6144_v10, 16  ;;  %v4577_v21 = vcombine.low %v3908_v48, %v3922_v57  ;;  %v3950_v29 = vsel %vm5296_vm3, %v3945_v20, %v3949_v17 }
 0x316   : > { %5120 = vmatprep.subr.msk.bf16.mxu0 %vm1218_vm6, %v6117_v63  ;;  %v4578_v30 = vcombine.low %v3936_v13, %v3950_v29  ;;  %v4111_v63 = vrot.slane %v6111_v37, 5  ;;  %v4119_v37 = vrot.slane %v6124_v55, 5  ;;  %v4124_v55 = vsel %vm5587_vm14, %v4588_v36, %v4123_v40 }
 0x317   : > { %v3977_v34 = vrot.slane %v3975_v45, 5  ;;  %v4595_v4 = vcombine.low %v4124_v55, %v4128_v27 }
 0x318   : > { %v4112_v16 = vsel %vm5587_vm14, %v4585_v26, %v4111_v63  ;;  %v4120_v58 = vsel %vm5587_vm14, %v4587_v2, %v4119_v37 }
 0x319   : > { %v3978_v46 = vsel %vm5296_vm3, %v3973_v60, %v3977_v34  ;;  %v4593_v43 = vcombine.low %v4108_v50, %v4112_v16  ;;  %v4594_v42 = vcombine.low %v4116_v53, %v4120_v58 }
 0x31a   : > { %v4579_v51 = vcombine.low %v3964_v9, %v3978_v46 }
 0x31c   : > { %4928 = vmatmul.mubr.msk.bf16.gmra.mrb[12].mxu0 %vm1205_vm11, %v5166_v15  ;;  %v4088_v15 = vld [vmem:[#allocation3 + $0x48] sm:$0xe] }
 0x31d   : > { %4933 = vmatprep.mubr.msk.bf16.mxu0 %vm1205_vm11, %v4576_v5  ;;  %v4591_v52 = vrot.slane %v4088_v15, 9  ;;  %v4590_v5 = vrot.slane %v4087_v23, 9 }
 0x31f   : > { %v4132_v54 = vsel %vm5587_vm14, %v4590_v5, %v4131_v18  ;;  %v4136_v1 = vsel %vm5587_vm14, %v4591_v52, %v4135_v14 }
 0x320   : > { %v4596_v28 = vcombine.low %v4132_v54, %v4136_v1 }
 0x324   : > { %4934 = vmatmul.mubr.msk.bf16.vlgmr.msra.gmra.mrb[8].mxu0 %vm1205_vm11, %v4577_v21 }
 0x325   : > { %4942 = vmatpush3.bf16.msra.mxu0 %v4164_v59  ;;  %4937 = vmatprep.mubr.msk.bf16.mxu0 %vm1205_vm11, %v4578_v30 }
 0x32c   : > { %4938 = vmatmul.mubr.msk.bf16.gmra.mrb[12].mxu0 %vm1205_vm11, %v4579_v51 }
 0x32d   : > { %4943 = vmatprep.mubr.msk.bf16.mxu0 %vm1205_vm11, %v4593_v43 }
 0x334   : > { %4944 = vmatmul.mubr.msk.bf16.vlgmr.msra.gmra.mrb[8].mxu0 %vm1205_vm11, %v4594_v42 }
 0x335   : > { %4947 = vmatprep.mubr.msk.bf16.mxu0 %vm1205_vm11, %v4595_v4 }
 0x33c   : > { %4948 = vmatmul.mubr.msk.bf16.gmra.mrb[12].mxu0 %vm1205_vm11, %v4596_v28 }
 0x407   : > { %v4945_v8 = vpop.f32.mrb[8].mxu0 }
 0x408   : > { %v4248_v41 = vadd.f32 %v4945_v8, %v4601_v0  ;;  %v4200_v49 = vpop.f32.mrb[9].mxu0 }
 0x409   : > { %v4246_v20 = vadd.f32 %v4601_v0, %v4200_v49  ;;  %v4946_v39 = vpop.f32.mrb[10].mxu0 }
 0x40a   : > { %v4256_v10 = vmax.f32 %v4248_v41, 0.0  ;;  %v4249_v31 = vadd.f32 %v4946_v39, %v4601_v0  ;;  %v4203_v24 = vpop.f32.mrb[11].mxu0 }
 0x40b   : > { %v4254_v44 = vmax.f32 %v4246_v20, 0.0  ;;  %v4247_v57 = vadd.f32 %v4601_v0, %v4203_v24 }
 0x40c   : > { %4264 = vst.msk [vmem:[%s278_s18 + $0x10] sm:$0xff] %vm1205_vm11, %v4256_v10  ;;  %v4257_v56 = vmax.f32 %v4249_v31, 0.0 }
 0x40d   : > { %4262 = vst.msk [vmem:[%s278_s18] sm:$0xff] %vm1205_vm11, %v4254_v44  ;;  %v4255_v45 = vmax.f32 %v4247_v57, 0.0 }
 0x40e   : > { %4265 = vst.msk [vmem:[%s278_s18 + $0x18] sm:$0xff] %vm1205_vm11, %v4257_v56 }
 0x40f   : > { %4263 = vst.msk [vmem:[%s278_s18 + $0x8] sm:$0xff] %vm1205_vm11, %v4255_v45  ;;  %v4949_v13 = vpop.f32.mrb[12].mxu0 }
 0x410   : > { %v4252_v17 = vadd.f32 %v4949_v13, %v4601_v0  ;;  %v4216_v48 = vpop.f32.mrb[13].mxu0 }
 0x411   : > { %v4250_v62 = vadd.f32 %v4601_v0, %v4216_v48  ;;  %v4950_v11 = vpop.f32.mrb[14].mxu0 }
 0x412   : > { %v4260_v21 = vmax.f32 %v4252_v17, 0.0  ;;  %v4253_v59 = vadd.f32 %v4950_v11, %v4601_v0  ;;  %v4219_v29 = vpop.f32.mrb[15].mxu0 }
 0x413   : > { %v4258_v30 = vmax.f32 %v4250_v62, 0.0  ;;  %v4251_v7 = vadd.f32 %v4601_v0, %v4219_v29 }
 0x414   : > { %4268 = vst.msk [vmem:[%s278_s18 + $0x30] sm:$0xff] %vm1205_vm11, %v4260_v21  ;;  %v4261_v60 = vmax.f32 %v4253_v59, 0.0 }
 0x415   : > { %4266 = vst.msk [vmem:[%s278_s18 + $0x20] sm:$0xff] %vm1205_vm11, %v4258_v30  ;;  %v4259_v34 = vmax.f32 %v4251_v7, 0.0 }
 0x416   : > { %4269 = vst.msk [vmem:[%s278_s18 + $0x38] sm:$0xff] %vm1205_vm11, %v4261_v60 }
 0x417   : > { %4267 = vst.msk [vmem:[%s278_s18 + $0x28] sm:$0xff] %vm1205_vm11, %v4259_v34 }
 0x418 PF: > { %s17_s24 = sadd.s32 1, %s5173_s24  }
 0x419   : > { %p14_p4 = scmp.ge.s32.totalorder %s17_s24, 4  }
 0x41b   :  { %16 = sbr.rel (!%p14_p4) target bundleno = 1 (0x1), region = 101 }

</bundles_post_ra>
